<compile_context>
chip_gen: v7x
topology: tpu7x:2x2x1
jax: 0.10.0
libtpu: 0.0.40
codegen_flags: <defaults>
</compile_context>

<pallas_src>
import functools

import jax
import jax.numpy as jnp
from jax.experimental import pallas as pl
from jax.experimental.pallas import tpu as pltpu


def _round_up(v, m):
    return (v + m - 1) // m * m


def _mish(v):
    # mish(x) = x * tanh(softplus(x)).  With u = exp(x):
    #   tanh(softplus(x)) = (u^2 + 2u) / (u^2 + 2u + 2)
    # The divide goes to the EUP (approx reciprocal) instead of the VALU.
    u = jnp.exp(jnp.minimum(v, 20.0))          # clamp: u^2 stays finite in f32
    n = u * (u + 2.0)
    t = n * pl.reciprocal(n + 2.0, approx=True)
    return jnp.where(v > 20.0, v, v * t)       # mish(x) -> x for large x


def _prenet_kernel(x_ref, top_ref, bot_ref, keep_ref,
                   w1_ref, b1_ref, w2_ref, b2_ref, wfc_ref, bfc_ref,
                   o_ref, *, seq_len):
    # Block shapes:
    #   x_ref, o_ref : (1, TT, Hp)       top_ref/bot_ref : (1, 1, 2, Hp)
    #   keep_ref     : (1, TT, 1)        w1/w2 : (3, Hp, Hp)   wfc : (Hp, Hp)
    #   b1/b2/bfc    : (1, Hp)
    x = x_ref[0].astype(jnp.float32)                 # (TT, Hp)
    tt = x.shape[0]
    top = top_ref[0, 0].astype(jnp.float32)          # rows t0-2, t0-1
    bot = bot_ref[0, 0].astype(jnp.float32)          # rows t0+TT, t0+TT+1
    # Extended tile: ext row r <-> time t0 + r - 2.
    x_ext = jnp.concatenate([top, x, bot], axis=0)   # (TT+4, Hp)

    def conv_mish(h_ext, w_ref, b_ref, n_out):
        # h_ext has n_out + 2 rows; produces n_out rows (drops a 1-row border
        # each side).  Three accumulating K=Hp matmuls (no (TT,3Hp) concat):
        # bf16 operands, f32 accumulation on the MXU.
        hb = h_ext.astype(jnp.bfloat16)
        y = jnp.dot(hb[0:n_out], w_ref[0], preferred_element_type=jnp.float32)
        y = y + jnp.dot(hb[1:n_out + 1], w_ref[1],
                        preferred_element_type=jnp.float32)
        y = y + jnp.dot(hb[2:n_out + 2], w_ref[2],
                        preferred_element_type=jnp.float32)
        y = y + b_ref[...].astype(jnp.float32)
        return _mish(y)

    # Conv1 -> Mish  (valid for ext rows 1 .. TT+2, i.e. times t0-1 .. t0+TT).
    h1 = conv_mish(x_ext, w1_ref, b1_ref, tt + 2)
    # Conv2's 'same' zero-padding applies to h1 *after* Mish: zero h1 rows whose
    # time position lies outside [0, seq_len) (sequence edges / padded tail).
    t0 = pl.program_id(1) * tt
    tpos = t0 - 1 + jax.lax.broadcasted_iota(jnp.int32, (tt + 2, 1), 0)
    h1 = jnp.where((tpos >= 0) & (tpos < seq_len), h1, 0.0)
    # Conv2 -> Mish  (valid for ext rows 2 .. TT+1 == exactly this tile's rows).
    h2 = conv_mish(h1, w2_ref, b2_ref, tt)

    # Linear projection + residual (O == H).
    out = jnp.dot(h2.astype(jnp.bfloat16), wfc_ref[...],
                  preferred_element_type=jnp.float32)
    out = out + bfc_ref[...].astype(jnp.float32) + x

    # masked_fill(mask, 0): exact zeros (NaN-safe); mask kept un-broadcast.
    keep = keep_ref[0]                                # (TT, 1), 1.0 = keep
    out = jnp.where(keep > 0.5, out, 0.0)
    o_ref[0] = out.astype(o_ref.dtype)


def prenet_forward(x, mask, params, *, tile_t=1024):
    """x: (B, T, H); mask: (B, T) bool (True = masked) or None; params: dict."""
    B, T, H = x.shape
    O = params["w_fc"].shape[0]
    assert O == H, "Prenet residual add requires out_dim == hidden_dim"

    Hp = _round_up(H, 128)                           # lane-dense channel dim
    sub = 8 if x.dtype == jnp.float32 else 16        # sublane granularity

    # ---- time-tile sizing: as big as a ~36 MiB VMEM budget allows ----
    # Live VMEM estimate ~ 40 B per tile element (double-buffered I/O + f32
    # intermediates) + ~32*Hp^2 B of resident weights.
    vmem_budget = 36 * 1024 * 1024
    tt_cap = max(sub, ((vmem_budget - 32 * Hp * Hp) // (40 * Hp)) // sub * sub)
    Tp_min = _round_up(T, sub)
    TT = min(_round_up(min(tile_t, Tp_min), sub), Tp_min, tt_cap)
    # v7x has 2 TensorCores sharded over "parallel" grid axes: guarantee >= 2
    # grid steps when the batch axis alone can't provide them.
    if B == 1 and TT >= Tp_min and Tp_min > sub:
        TT = _round_up((Tp_min + 1) // 2, sub)
    Tp = _round_up(T, TT)
    nT = Tp // TT

    f32, bf16 = jnp.float32, jnp.bfloat16

    # ---- plain-JAX glue: repack PyTorch-convention weights ----
    def pack_conv(w, b):                             # w: (C_out, C_in, 3)
        wt = jnp.transpose(w, (2, 1, 0)).astype(f32)         # (3, C_in, C_out)
        wt = jnp.pad(wt, ((0, 0), (0, Hp - H), (0, Hp - H)))
        return (wt.astype(bf16),                              # (3, Hp, Hp)
                jnp.pad(b.astype(f32), (0, Hp - H)).reshape(1, Hp))

    w1, b1 = pack_conv(params["w_conv1"], params["b_conv1"])
    w2, b2 = pack_conv(params["w_conv2"], params["b_conv2"])
    wfc = jnp.pad(jnp.transpose(params["w_fc"], (1, 0)).astype(f32),
                  ((0, Hp - H), (0, Hp - O))).astype(bf16)    # (Hp, Hp)
    bfc = jnp.pad(params["b_fc"].astype(f32), (0, Hp - O)).reshape(1, Hp)

    # ---- activations: pad only when shapes are not already aligned ----
    needs_pad = (Hp != H) or (Tp != T)
    if needs_pad:
        xp = jnp.pad(x, ((0, 0), (0, Tp - T), (0, Hp - H)))   # (B, Tp, Hp)
    else:
        xp = x                                                # no extra HBM pass

    # 2-row conv halos per tile, gathered directly from xp (no full padded
    # copy): clipped indices + zero-fill for out-of-range rows.
    base = jnp.arange(nT) * TT
    top_t = base[:, None] + jnp.array([-2, -1])[None, :]      # (nT, 2)
    bot_t = base[:, None] + jnp.array([TT, TT + 1])[None, :]  # (nT, 2)

    def gather_halo(idx):
        valid = ((idx >= 0) & (idx < Tp)).astype(xp.dtype)    # (nT, 2)
        g = jnp.take(xp, jnp.clip(idx, 0, Tp - 1).reshape(-1), axis=1)
        return g.reshape(B, nT, 2, Hp) * valid[None, :, :, None]

    halo_top = gather_halo(top_t)
    halo_bot = gather_halo(bot_t)

    # Padding mask passed un-broadcast: (B, Tp, 1) float32, 1.0 = keep.
    # TODO(synk): could be int8/bool to shave a small HBM stream, kept f32 for
    # layout robustness at arbitrary TT (int8 sublane tiling is 32-deep).
    if mask is None:
        keep = jnp.ones((B, Tp, 1), f32)
    else:
        keep = jnp.pad((~mask).astype(f32), ((0, 0), (0, Tp - T)))[:, :, None]

    kernel = functools.partial(_prenet_kernel, seq_len=T)

    est_bytes = 40 * TT * Hp + 32 * Hp * Hp + (2 << 20)
    vmem_limit = min(48 * 1024 * 1024,
                     max(32 * 1024 * 1024, int(est_bytes * 1.3)))

    out = pl.pallas_call(
        kernel,
        out_shape=jax.ShapeDtypeStruct((B, Tp, Hp), x.dtype),
        grid_spec=pltpu.PrefetchScalarGridSpec(
            num_scalar_prefetch=0,
            grid=(B, nT),
            in_specs=[
                pl.BlockSpec((1, TT, Hp), lambda b, i: (b, i, 0)),        # x tile
                pl.BlockSpec((1, 1, 2, Hp), lambda b, i: (b, i, 0, 0)),   # top halo
                pl.BlockSpec((1, 1, 2, Hp), lambda b, i: (b, i, 0, 0)),   # bottom halo
                pl.BlockSpec((1, TT, 1), lambda b, i: (b, i, 0)),         # keep mask
                pl.BlockSpec((3, Hp, Hp), lambda b, i: (0, 0, 0)),        # w1 (3 taps)
                pl.BlockSpec((1, Hp), lambda b, i: (0, 0)),               # b1
                pl.BlockSpec((3, Hp, Hp), lambda b, i: (0, 0, 0)),        # w2
                pl.BlockSpec((1, Hp), lambda b, i: (0, 0)),               # b2
                pl.BlockSpec((Hp, Hp), lambda b, i: (0, 0)),              # w_fc
                pl.BlockSpec((1, Hp), lambda b, i: (0, 0)),               # b_fc
            ],
            out_specs=pl.BlockSpec((1, TT, Hp), lambda b, i: (b, i, 0)),
        ),
        compiler_params=pltpu.CompilerParams(
            dimension_semantics=("parallel", "parallel"),
            vmem_limit_bytes=vmem_limit),
    )(xp, halo_top, halo_bot, keep, w1, b1, w2, b2, wfc, bfc)

    if needs_pad:
        return out[:, :T, :O]
    return out


def prenet_reference(x, mask, params):
    """Pure-JAX f32 reference matching the PyTorch module (for validation)."""
    def mish(v):
        return v * jnp.tanh(jax.nn.softplus(v))

    def conv3(h, w, b):                              # h (B,T,H), w (C_out,C_in,3)
        hp = jnp.pad(h, ((0, 0), (1, 1), (0, 0)))
        y = (jnp.einsum("bti,oi->bto", hp[:, :-2], w[:, :, 0])
             + jnp.einsum("bti,oi->bto", hp[:, 1:-1], w[:, :, 1])
             + jnp.einsum("bti,oi->bto", hp[:, 2:], w[:, :, 2]))
        return y + b

    h = mish(conv3(x, params["w_conv1"], params["b_conv1"]))
    h = mish(conv3(h, params["w_conv2"], params["b_conv2"]))
    out = h @ params["w_fc"].T + params["b_fc"] + x
    if mask is not None:
        out = jnp.where(mask[:, :, None], 0.0, out)
    return out


def init_params(key, hidden_dim, out_dim):
    ks = jax.random.split(key, 6)
    scale = 0.1
    return {
        "w_conv1": scale * jax.random.normal(ks[0], (hidden_dim, hidden_dim, 3), jnp.float32),
        "b_conv1": scale * jax.random.normal(ks[1], (hidden_dim,), jnp.float32),
        "w_conv2": scale * jax.random.normal(ks[2], (hidden_dim, hidden_dim, 3), jnp.float32),
        "b_conv2": scale * jax.random.normal(ks[3], (hidden_dim,), jnp.float32),
        "w_fc":    scale * jax.random.normal(ks[4], (out_dim, hidden_dim), jnp.float32),
        "b_fc":    scale * jax.random.normal(ks[5], (out_dim,), jnp.float32),
    }


if __name__ == "__main__":
    # Small shapes consistent with the module's forward: (B, T, hidden_dim).
    B, T, H = 2, 16, 32
    out_dim = H  # residual add requires out_dim == hidden_dim
    key = jax.random.PRNGKey(0)
    kx, km, kp = jax.random.split(key, 3)

    x = jax.random.normal(kx, (B, T, H), jnp.float32)
    # boolean padding mask: True = position is masked (zeroed in output)
    mask = jax.random.bernoulli(km, 0.25, (B, T))
    params = init_params(kp, H, out_dim)

    # TODO(synk): Dropout is treated as identity (inference mode); training-time
    # stochastic dropout would use pltpu.prng_seed/prng_random_bits in-kernel.
    out = prenet_forward(x, mask, params)
    jax.block_until_ready(out)
    assert out.shape == (B, T, H)

    ref = prenet_reference(x, mask, params)
    err = float(jnp.max(jnp.abs(out - ref)))
    assert err < 1e-1, f"max abs diff vs reference: {err}"

    # Also exercise the B=1 dual-tile path and the no-mask path.
    out1 = prenet_forward(x[:1], None, params)
    jax.block_until_ready(out1)
    ref1 = prenet_reference(x[:1], None, params)
    err1 = float(jnp.max(jnp.abs(out1 - ref1)))
    assert err1 < 1e-1, f"max abs diff vs reference (B=1): {err1}"
    print("KERNEL_OK")
</pallas_src>

<mosaic_0001>
module attributes {stable_mosaic.version = 11 : i64} {
  func.func @_prenet_kernel(%arg0: i32, %arg1: i32, %arg2: memref<1x16x128xf32, #tpu.memory_space<vmem>>, %arg3: memref<1x1x2x128xf32, #tpu.memory_space<vmem>>, %arg4: memref<1x1x2x128xf32, #tpu.memory_space<vmem>>, %arg5: memref<1x16x1xf32, #tpu.memory_space<vmem>>, %arg6: memref<3x128x128xbf16, #tpu.memory_space<vmem>>, %arg7: memref<1x128xf32, #tpu.memory_space<vmem>>, %arg8: memref<3x128x128xbf16, #tpu.memory_space<vmem>>, %arg9: memref<1x128xf32, #tpu.memory_space<vmem>>, %arg10: memref<128x128xbf16, #tpu.memory_space<vmem>>, %arg11: memref<1x128xf32, #tpu.memory_space<vmem>>, %arg12: memref<1x16x128xf32, #tpu.memory_space<vmem>>) attributes {dimension_semantics = [#tpu.dimension_semantics<parallel>, #tpu.dimension_semantics<parallel>], iteration_bounds = array<i64: 2, 1>, scalar_prefetch = 0 : i64, scratch_operands = 0 : i64, tpu.core_type = #tpu.core_type<tc>, window_params = [{transform_indices = @transform_0, window_bounds = array<i64: 1, 16, 128>}, {transform_indices = @transform_1, window_bounds = array<i64: 1, 1, 2, 128>}, {transform_indices = @transform_2, window_bounds = array<i64: 1, 1, 2, 128>}, {transform_indices = @transform_3, window_bounds = array<i64: 1, 16, 1>}, {pipeline_mode = #tpu.pipeline_mode<synchronous>, transform_indices = @transform_4, window_bounds = array<i64: 3, 128, 128>}, {pipeline_mode = #tpu.pipeline_mode<synchronous>, transform_indices = @transform_5, window_bounds = array<i64: 1, 128>}, {pipeline_mode = #tpu.pipeline_mode<synchronous>, transform_indices = @transform_6, window_bounds = array<i64: 3, 128, 128>}, {pipeline_mode = #tpu.pipeline_mode<synchronous>, transform_indices = @transform_7, window_bounds = array<i64: 1, 128>}, {pipeline_mode = #tpu.pipeline_mode<synchronous>, transform_indices = @transform_8, window_bounds = array<i64: 128, 128>}, {pipeline_mode = #tpu.pipeline_mode<synchronous>, transform_indices = @transform_9, window_bounds = array<i64: 1, 128>}, {transform_indices = @transform_10, window_bounds = array<i64: 1, 16, 128>}]} {
    %c0 = arith.constant 0 : index
    %c0_0 = arith.constant 0 : index
    %c0_1 = arith.constant 0 : index
    %0 = vector.load %arg2[%c0, %c0_0, %c0_1] : memref<1x16x128xf32, #tpu.memory_space<vmem>>, vector<1x16x128xf32>
    %1 = vector.shape_cast %0 : vector<1x16x128xf32> to vector<16x128xf32>
    %c0_2 = arith.constant 0 : index
    %c0_3 = arith.constant 0 : index
    %c0_4 = arith.constant 0 : index
    %c0_5 = arith.constant 0 : index
    %2 = vector.load %arg3[%c0_2, %c0_3, %c0_4, %c0_5] : memref<1x1x2x128xf32, #tpu.memory_space<vmem>>, vector<1x1x2x128xf32>
    %3 = vector.shape_cast %2 : vector<1x1x2x128xf32> to vector<2x128xf32>
    %c0_6 = arith.constant 0 : index
    %c0_7 = arith.constant 0 : index
    %c0_8 = arith.constant 0 : index
    %c0_9 = arith.constant 0 : index
    %4 = vector.load %arg4[%c0_6, %c0_7, %c0_8, %c0_9] : memref<1x1x2x128xf32, #tpu.memory_space<vmem>>, vector<1x1x2x128xf32>
    %5 = vector.shape_cast %4 : vector<1x1x2x128xf32> to vector<2x128xf32>
    %6 = tpu.concatenate %3, %1, %5 in 0 : vector<2x128xf32>, vector<16x128xf32>, vector<2x128xf32> -> vector<20x128xf32>
    %7 = arith.truncf %6 : vector<20x128xf32> to vector<20x128xbf16>
    %8 = vector.extract_strided_slice %7 {offsets = [0, 0], sizes = [18, 128], strides = [1, 1]} : vector<20x128xbf16> to vector<18x128xbf16>
    %c0_10 = arith.constant 0 : index
    %c0_11 = arith.constant 0 : index
    %c0_12 = arith.constant 0 : index
    %9 = vector.load %arg6[%c0_10, %c0_11, %c0_12] : memref<3x128x128xbf16, #tpu.memory_space<vmem>>, vector<1x128x128xbf16>
    %10 = vector.shape_cast %9 : vector<1x128x128xbf16> to vector<128x128xbf16>
    %cst = arith.constant dense<0.000000e+00> : vector<18x128xf32>
    %11 = tpu.matmul %8, %10, %cst {dimension_numbers = #tpu.dot_dimension_numbers<[1], [0], [0], [1], [0, 0, 1, 1], [], []>} : vector<18x128xbf16>, vector<128x128xbf16>, vector<18x128xf32> -> vector<18x128xf32>
    %12 = vector.extract_strided_slice %7 {offsets = [1, 0], sizes = [18, 128], strides = [1, 1]} : vector<20x128xbf16> to vector<18x128xbf16>
    %c1 = arith.constant 1 : index
    %c0_13 = arith.constant 0 : index
    %c0_14 = arith.constant 0 : index
    %13 = vector.load %arg6[%c1, %c0_13, %c0_14] : memref<3x128x128xbf16, #tpu.memory_space<vmem>>, vector<1x128x128xbf16>
    %14 = vector.shape_cast %13 : vector<1x128x128xbf16> to vector<128x128xbf16>
    %cst_15 = arith.constant dense<0.000000e+00> : vector<18x128xf32>
    %15 = tpu.matmul %12, %14, %cst_15 {dimension_numbers = #tpu.dot_dimension_numbers<[1], [0], [0], [1], [0, 0, 1, 1], [], []>} : vector<18x128xbf16>, vector<128x128xbf16>, vector<18x128xf32> -> vector<18x128xf32>
    %16 = arith.addf %11, %15 : vector<18x128xf32>
    %17 = vector.extract_strided_slice %7 {offsets = [2, 0], sizes = [18, 128], strides = [1, 1]} : vector<20x128xbf16> to vector<18x128xbf16>
    %c2 = arith.constant 2 : index
    %c0_16 = arith.constant 0 : index
    %c0_17 = arith.constant 0 : index
    %18 = vector.load %arg6[%c2, %c0_16, %c0_17] : memref<3x128x128xbf16, #tpu.memory_space<vmem>>, vector<1x128x128xbf16>
    %19 = vector.shape_cast %18 : vector<1x128x128xbf16> to vector<128x128xbf16>
    %cst_18 = arith.constant dense<0.000000e+00> : vector<18x128xf32>
    %20 = tpu.matmul %17, %19, %cst_18 {dimension_numbers = #tpu.dot_dimension_numbers<[1], [0], [0], [1], [0, 0, 1, 1], [], []>} : vector<18x128xbf16>, vector<128x128xbf16>, vector<18x128xf32> -> vector<18x128xf32>
    %21 = arith.addf %16, %20 : vector<18x128xf32>
    %c0_19 = arith.constant 0 : index
    %c0_20 = arith.constant 0 : index
    %22 = vector.load %arg7[%c0_19, %c0_20] : memref<1x128xf32, #tpu.memory_space<vmem>>, vector<1x128xf32>
    %23 = vector.broadcast %22 : vector<1x128xf32> to vector<18x128xf32>
    %24 = arith.addf %21, %23 : vector<18x128xf32>
    %cst_21 = arith.constant 2.000000e+01 : f32
    %25 = vector.broadcast %cst_21 : f32 to vector<18x128xf32>
    %26 = arith.minimumf %24, %25 : vector<18x128xf32>
    %27 = math.exp %26 : vector<18x128xf32>
    %cst_22 = arith.constant 2.000000e+00 : f32
    %28 = vector.broadcast %cst_22 : f32 to vector<18x128xf32>
    %29 = arith.addf %27, %28 : vector<18x128xf32>
    %30 = arith.mulf %27, %29 : vector<18x128xf32>
    %cst_23 = arith.constant 2.000000e+00 : f32
    %31 = vector.broadcast %cst_23 : f32 to vector<18x128xf32>
    %32 = arith.addf %30, %31 : vector<18x128xf32>
    %33 = tpu.reciprocal %32 {approx = true} : vector<18x128xf32> -> vector<18x128xf32>
    %34 = arith.mulf %30, %33 : vector<18x128xf32>
    %cst_24 = arith.constant 2.000000e+01 : f32
    %35 = vector.broadcast %cst_24 : f32 to vector<18x128xf32>
    %36 = arith.cmpf ogt, %24, %35 : vector<18x128xf32>
    %37 = arith.mulf %24, %34 : vector<18x128xf32>
    %38 = arith.select %36, %24, %37 : vector<18x128xi1>, vector<18x128xf32>
    %c16_i32 = arith.constant 16 : i32
    %39 = arith.muli %arg1, %c16_i32 : i32
    %c1_i32 = arith.constant 1 : i32
    %40 = arith.subi %39, %c1_i32 : i32
    %41 = tpu.iota {dimensions = array<i32: 0>} : vector<18x1xi32>
    %42 = vector.broadcast %40 : i32 to vector<18x1xi32>
    %43 = arith.addi %42, %41 : vector<18x1xi32>
    %c0_i32 = arith.constant 0 : i32
    %44 = vector.broadcast %c0_i32 : i32 to vector<18x1xi32>
    %45 = arith.cmpi sge, %43, %44 : vector<18x1xi32>
    %c16_i32_25 = arith.constant 16 : i32
    %46 = vector.broadcast %c16_i32_25 : i32 to vector<18x1xi32>
    %47 = arith.cmpi slt, %43, %46 : vector<18x1xi32>
    %48 = arith.andi %45, %47 : vector<18x1xi1>
    %cst_26 = arith.constant 0.000000e+00 : f32
    %49 = vector.shape_cast %48 : vector<18x1xi1> to vector<18x1xi1>
    %50 = vector.broadcast %49 : vector<18x1xi1> to vector<18x128xi1>
    %51 = vector.broadcast %cst_26 : f32 to vector<18x128xf32>
    %52 = arith.select %50, %38, %51 : vector<18x128xi1>, vector<18x128xf32>
    %53 = arith.truncf %52 : vector<18x128xf32> to vector<18x128xbf16>
    %54 = vector.extract_strided_slice %53 {offsets = [0, 0], sizes = [16, 128], strides = [1, 1]} : vector<18x128xbf16> to vector<16x128xbf16>
    %c0_27 = arith.constant 0 : index
    %c0_28 = arith.constant 0 : index
    %c0_29 = arith.constant 0 : index
    %55 = vector.load %arg8[%c0_27, %c0_28, %c0_29] : memref<3x128x128xbf16, #tpu.memory_space<vmem>>, vector<1x128x128xbf16>
    %56 = vector.shape_cast %55 : vector<1x128x128xbf16> to vector<128x128xbf16>
    %cst_30 = arith.constant dense<0.000000e+00> : vector<16x128xf32>
    %57 = tpu.matmul %54, %56, %cst_30 {dimension_numbers = #tpu.dot_dimension_numbers<[1], [0], [0], [1], [0, 0, 1, 1], [], []>} : vector<16x128xbf16>, vector<128x128xbf16>, vector<16x128xf32> -> vector<16x128xf32>
    %58 = vector.extract_strided_slice %53 {offsets = [1, 0], sizes = [16, 128], strides = [1, 1]} : vector<18x128xbf16> to vector<16x128xbf16>
    %c1_31 = arith.constant 1 : index
    %c0_32 = arith.constant 0 : index
    %c0_33 = arith.constant 0 : index
    %59 = vector.load %arg8[%c1_31, %c0_32, %c0_33] : memref<3x128x128xbf16, #tpu.memory_space<vmem>>, vector<1x128x128xbf16>
    %60 = vector.shape_cast %59 : vector<1x128x128xbf16> to vector<128x128xbf16>
    %cst_34 = arith.constant dense<0.000000e+00> : vector<16x128xf32>
    %61 = tpu.matmul %58, %60, %cst_34 {dimension_numbers = #tpu.dot_dimension_numbers<[1], [0], [0], [1], [0, 0, 1, 1], [], []>} : vector<16x128xbf16>, vector<128x128xbf16>, vector<16x128xf32> -> vector<16x128xf32>
    %62 = arith.addf %57, %61 : vector<16x128xf32>
    %63 = vector.extract_strided_slice %53 {offsets = [2, 0], sizes = [16, 128], strides = [1, 1]} : vector<18x128xbf16> to vector<16x128xbf16>
    %c2_35 = arith.constant 2 : index
    %c0_36 = arith.constant 0 : index
    %c0_37 = arith.constant 0 : index
    %64 = vector.load %arg8[%c2_35, %c0_36, %c0_37] : memref<3x128x128xbf16, #tpu.memory_space<vmem>>, vector<1x128x128xbf16>
    %65 = vector.shape_cast %64 : vector<1x128x128xbf16> to vector<128x128xbf16>
    %cst_38 = arith.constant dense<0.000000e+00> : vector<16x128xf32>
    %66 = tpu.matmul %63, %65, %cst_38 {dimension_numbers = #tpu.dot_dimension_numbers<[1], [0], [0], [1], [0, 0, 1, 1], [], []>} : vector<16x128xbf16>, vector<128x128xbf16>, vector<16x128xf32> -> vector<16x128xf32>
    %67 = arith.addf %62, %66 : vector<16x128xf32>
    %c0_39 = arith.constant 0 : index
    %c0_40 = arith.constant 0 : index
    %68 = vector.load %arg9[%c0_39, %c0_40] : memref<1x128xf32, #tpu.memory_space<vmem>>, vector<1x128xf32>
    %69 = vector.broadcast %68 : vector<1x128xf32> to vector<16x128xf32>
    %70 = arith.addf %67, %69 : vector<16x128xf32>
    %cst_41 = arith.constant 2.000000e+01 : f32
    %71 = vector.broadcast %cst_41 : f32 to vector<16x128xf32>
    %72 = arith.minimumf %70, %71 : vector<16x128xf32>
    %73 = math.exp %72 : vector<16x128xf32>
    %cst_42 = arith.constant 2.000000e+00 : f32
    %74 = vector.broadcast %cst_42 : f32 to vector<16x128xf32>
    %75 = arith.addf %73, %74 : vector<16x128xf32>
    %76 = arith.mulf %73, %75 : vector<16x128xf32>
    %cst_43 = arith.constant 2.000000e+00 : f32
    %77 = vector.broadcast %cst_43 : f32 to vector<16x128xf32>
    %78 = arith.addf %76, %77 : vector<16x128xf32>
    %79 = tpu.reciprocal %78 {approx = true} : vector<16x128xf32> -> vector<16x128xf32>
    %80 = arith.mulf %76, %79 : vector<16x128xf32>
    %cst_44 = arith.constant 2.000000e+01 : f32
    %81 = vector.broadcast %cst_44 : f32 to vector<16x128xf32>
    %82 = arith.cmpf ogt, %70, %81 : vector<16x128xf32>
    %83 = arith.mulf %70, %80 : vector<16x128xf32>
    %84 = arith.select %82, %70, %83 : vector<16x128xi1>, vector<16x128xf32>
    %85 = arith.truncf %84 : vector<16x128xf32> to vector<16x128xbf16>
    %c0_45 = arith.constant 0 : index
    %c0_46 = arith.constant 0 : index
    %86 = vector.load %arg10[%c0_45, %c0_46] : memref<128x128xbf16, #tpu.memory_space<vmem>>, vector<128x128xbf16>
    %cst_47 = arith.constant dense<0.000000e+00> : vector<16x128xf32>
    %87 = tpu.matmul %85, %86, %cst_47 {dimension_numbers = #tpu.dot_dimension_numbers<[1], [0], [0], [1], [0, 0, 1, 1], [], []>} : vector<16x128xbf16>, vector<128x128xbf16>, vector<16x128xf32> -> vector<16x128xf32>
    %c0_48 = arith.constant 0 : index
    %c0_49 = arith.constant 0 : index
    %88 = vector.load %arg11[%c0_48, %c0_49] : memref<1x128xf32, #tpu.memory_space<vmem>>, vector<1x128xf32>
    %89 = vector.broadcast %88 : vector<1x128xf32> to vector<16x128xf32>
    %90 = arith.addf %87, %89 : vector<16x128xf32>
    %91 = arith.addf %90, %1 : vector<16x128xf32>
    %c0_50 = arith.constant 0 : index
    %c0_51 = arith.constant 0 : index
    %c0_52 = arith.constant 0 : index
    %92 = vector.load %arg5[%c0_50, %c0_51, %c0_52] : memref<1x16x1xf32, #tpu.memory_space<vmem>>, vector<1x16x1xf32>
    %93 = vector.shape_cast %92 : vector<1x16x1xf32> to vector<16x1xf32>
    %cst_53 = arith.constant 5.000000e-01 : f32
    %94 = vector.broadcast %cst_53 : f32 to vector<16x1xf32>
    %95 = arith.cmpf ogt, %93, %94 : vector<16x1xf32>
    %cst_54 = arith.constant 0.000000e+00 : f32
    %96 = vector.shape_cast %95 : vector<16x1xi1> to vector<16x1xi1>
    %97 = vector.broadcast %96 : vector<16x1xi1> to vector<16x128xi1>
    %98 = vector.broadcast %cst_54 : f32 to vector<16x128xf32>
    %99 = arith.select %97, %91, %98 : vector<16x128xi1>, vector<16x128xf32>
    %c0_55 = arith.constant 0 : index
    %c0_56 = arith.constant 0 : index
    %c0_57 = arith.constant 0 : index
    %100 = vector.load %arg12[%c0_55, %c0_56, %c0_57] : memref<1x16x128xf32, #tpu.memory_space<vmem>>, vector<1x16x128xf32>
    %101 = vector.shape_cast %100 : vector<1x16x128xf32> to vector<16x128xf32>
    %102 = vector.shape_cast %99 : vector<16x128xf32> to vector<1x16x128xf32>
    tpu.vector_store %arg12[%c0_55, %c0_56, %c0_57], %102 {strides = array<i32>} : memref<1x16x128xf32, #tpu.memory_space<vmem>>, vector<1x16x128xf32>,
    return
  }
  func.func @transform_0(%arg0: i32, %arg1: i32) -> (i32, i32, i32) {
    %c0_i32 = arith.constant 0 : i32
    %c0_i32_0 = arith.constant 0 : i32
    return %arg0, %arg1, %c0_i32 : i32, i32, i32
  }
  func.func @transform_1(%arg0: i32, %arg1: i32) -> (i32, i32, i32, i32) {
    %c0_i32 = arith.constant 0 : i32
    %c0_i32_0 = arith.constant 0 : i32
    %c0_i32_1 = arith.constant 0 : i32
    return %arg0, %arg1, %c0_i32, %c0_i32_0 : i32, i32, i32, i32
  }
  func.func @transform_2(%arg0: i32, %arg1: i32) -> (i32, i32, i32, i32) {
    %c0_i32 = arith.constant 0 : i32
    %c0_i32_0 = arith.constant 0 : i32
    %c0_i32_1 = arith.constant 0 : i32
    return %arg0, %arg1, %c0_i32, %c0_i32_0 : i32, i32, i32, i32
  }
  func.func @transform_3(%arg0: i32, %arg1: i32) -> (i32, i32, i32) {
    %c0_i32 = arith.constant 0 : i32
    %c0_i32_0 = arith.constant 0 : i32
    return %arg0, %arg1, %c0_i32 : i32, i32, i32
  }
  func.func @transform_4(%arg0: i32, %arg1: i32) -> (i32, i32, i32) {
    %c0_i32 = arith.constant 0 : i32
    %c0_i32_0 = arith.constant 0 : i32
    %c0_i32_1 = arith.constant 0 : i32
    %c0_i32_2 = arith.constant 0 : i32
    return %c0_i32, %c0_i32_0, %c0_i32_1 : i32, i32, i32
  }
  func.func @transform_5(%arg0: i32, %arg1: i32) -> (i32, i32) {
    %c0_i32 = arith.constant 0 : i32
    %c0_i32_0 = arith.constant 0 : i32
    %c0_i32_1 = arith.constant 0 : i32
    return %c0_i32, %c0_i32_0 : i32, i32
  }
  func.func @transform_6(%arg0: i32, %arg1: i32) -> (i32, i32, i32) {
    %c0_i32 = arith.constant 0 : i32
    %c0_i32_0 = arith.constant 0 : i32
    %c0_i32_1 = arith.constant 0 : i32
    %c0_i32_2 = arith.constant 0 : i32
    return %c0_i32, %c0_i32_0, %c0_i32_1 : i32, i32, i32
  }
  func.func @transform_7(%arg0: i32, %arg1: i32) -> (i32, i32) {
    %c0_i32 = arith.constant 0 : i32
    %c0_i32_0 = arith.constant 0 : i32
    %c0_i32_1 = arith.constant 0 : i32
    return %c0_i32, %c0_i32_0 : i32, i32
  }
  func.func @transform_8(%arg0: i32, %arg1: i32) -> (i32, i32) {
    %c0_i32 = arith.constant 0 : i32
    %c0_i32_0 = arith.constant 0 : i32
    %c0_i32_1 = arith.constant 0 : i32
    return %c0_i32, %c0_i32_0 : i32, i32
  }
  func.func @transform_9(%arg0: i32, %arg1: i32) -> (i32, i32) {
    %c0_i32 = arith.constant 0 : i32
    %c0_i32_0 = arith.constant 0 : i32
    %c0_i32_1 = arith.constant 0 : i32
    return %c0_i32, %c0_i32_0 : i32, i32
  }
  func.func @transform_10(%arg0: i32, %arg1: i32) -> (i32, i32, i32) {
    %c0_i32 = arith.constant 0 : i32
    %c0_i32_0 = arith.constant 0 : i32
    return %arg0, %arg1, %c0_i32 : i32, i32, i32
  }
}

</mosaic_0001>

<bundles_post_ra>
// kernel: tpu_custom_call.1
= control target key start
LH: loop header
LB: loop body
LE: loop exit
PB: predicated region body
PF: predicated region fallthrough
CT: control target
= control target key end

     0   :  { %s3072_s0 = inlined_call_operand.hbm [shape: f32[2,16,128], index: 0, kind: input, shape index: {}]   ;;  %s3073_s1 = inlined_call_operand.hbm [shape: f32[2,1,2,128], index: 1, kind: input, shape index: {}]   ;;  %s3074_s2 = inlined_call_operand.hbm [shape: f32[2,1,2,128], index: 2, kind: input, shape index: {}]   ;;  %s3075_s3 = inlined_call_operand.vmem [shape: f32[2,16,1], index: 3, kind: input, shape index: {}]   ;;  %s3076_s4 = inlined_call_operand.hbm [shape: bf16[3,128,128], index: 4, kind: input, shape index: {}]   ;;  %s3077_s5 = inlined_call_operand.hbm [shape: f32[1,128], index: 5, kind: input, shape index: {}]   ;;  %s3078_s6 = inlined_call_operand.hbm [shape: bf16[3,128,128], index: 6, kind: input, shape index: {}]   ;;  %s3079_s7 = inlined_call_operand.hbm [shape: f32[1,128], index: 7, kind: input, shape index: {}]   ;;  %s3080_s8 = inlined_call_operand.vmem [shape: bf16[128,128], index: 8, kind: input, shape index: {}]   ;;  %s3081_s9 = inlined_call_operand.vmem [shape: f32[1,128], index: 9, kind: input, shape index: {}]   ;;  %s3082_s10 = inlined_call_operand.hbm [shape: f32[2,16,128], index: 10, kind: output, shape index: {}]  }
   0x1   :  { %3107 = sst [smem:[#allocation28_spill]] %s3073_s1 }
   0x2   :  { %3108 = sst [smem:[#allocation29_spill]] %s3075_s3 }
   0x3   :  { %3109 = sst [smem:[#allocation30_spill]] %s3076_s4 }
   0x4   :  { %3110 = sst [smem:[#allocation31_spill]] %s3078_s6 }
   0x5   :  { %3111 = sst [smem:[#allocation32_spill]] %s3081_s9 }
   0x6   :  { %3112 = sst [smem:[#allocation33_spill]] %s3082_s10 }
   0x7   :  { %15 = vsyncpa [#allocation3], 0 }
   0x8   :  { %17 = vsyncpa [#allocation3 + $0x1], 0 }
   0x9   :  { %18 = vsyncpa [#allocation6], 0 }
   0xa   :  { %20 = vsyncpa [#allocation6 + $0x1], 0 }
   0xb   :  { %21 = vsyncpa [#allocation9], 0 }
   0xc   :  { %22 = vsyncpa [#allocation12], 0 }
   0xd   :  { %23 = vsyncpa [#allocation4], 0 }
   0xe   :  { %25 = vsyncpa [#allocation4 + $0x1], 0  ;;  %s2605_s13 = smov 0   ;;  %s2607_s14 = smov 0  }
   0xf   :  { %s2609_s15 = smov 0   ;;  %s2611_s16 = smov 0  }
  0x10   :  { %s2613_s17 = smov 0   ;;  %s2615_s18 = smov 0  }
  0x11 LB: > { %3113 = sst [smem:[#allocation20_spill]] %s2510_s13  ;;  %s2636_s19 = sadd.s32 4294967295, %s2530_s18   ;;  %s2530_s18 = sphi %s2615_s18, %s31_s18   ;;  %s2526_s17 = sphi %s2613_s17, %s3164_s17   ;;  %s2522_s16 = sphi %s2611_s16, %s3163_s16   ;;  %s2518_s15 = sphi %s2609_s15, %s3159_s15   ;;  %s2514_s14 = sphi %s2607_s14, %s3162_s14   ;;  %s2510_s13 = sphi %s2605_s13, %s3161_s13  }
  0x12   : > { %3114 = sst [smem:[#allocation21_spill]] %s2518_s15  ;;  %p1734_p0 = scmp.ge.s32.totalorder %s2530_s18, 1 }
  0x13   : > { %3115 = sst [smem:[#allocation22_spill]] %s2522_s16  ;;  %p3084_p1 = scmp.eq.s32.totalorder %s2636_s19, 0 }
  0x14   : > { %3116 = sst [smem:[#allocation23_spill]] %s2530_s18  ;;  %p314_p2 = scmp.lt.s32.totalorder %s2530_s18, 3 }
  0x15   : > { %s2532_s21 = smov [#allocation8]   ;;  %s2533_s24 = smov [#allocation11]  }
  0x16   : > { %p2641_p3 = pnand %p1734_p0, %p314_p2  ;;  %s326_s22 = sshll.u32 %s2532_s21, 4  ;;  %s2645_s22 = int_to_ptr.vmem [resolvable:$true] %s326_s22 }
  0x17   : > { %s350_s25 = sshll.u32 %s2533_s24, 4  ;;  %s3119_s4 = sld [smem:[#allocation30_spill]]  ;;  %s2656_s25 = int_to_ptr.vmem [resolvable:$true] %s350_s25 }
  0x18   : > { %s3117_s20 = scalar_select %p2641_p3, 1, 0 }
  0x19   : > { %p2058_p4 = pneg %p2641_p3 }
  0x1b   : > { %p2652_p6 = pnand %p2058_p4, %p3084_p1 }
  0x1d   : > { %s3118_s23 = scalar_select %p2652_p6, 1, 0 }
  0x1e   : > { %s2234_s28 = scalar_lea.hbm %s3119_s4, 3072  ;;  %p2666_p8 = pneg %p2652_p6 }
  0x1f   : > { %p2235_p7 = scmp.ne.s32.totalorder %s3119_s4, %s2234_s28  ;;  %p2241_p11 = scmp.lt.u32.totalorder %s2234_s28, %s3119_s4 }
  0x20   : > { %s3120_s11 = scalar_select %p2666_p8, 1, 0 }
  0x21   : > { %p2237_p9 = pnand %p2666_p8, %p2235_p7 }
  0x23   : > { %p2238_p10 = pneg %p2237_p9 }
  0x25   : > { %p2243_p12 = pnand %p2241_p11, %p2238_p10 }
  0x27   : > { %2246 = shalt.err (!%p2243_p12)
}
  0x28   : > { %s2247_s24 = scalar_lea.vmem %s2645_s22, 3072  ;;  %p2255_p4 = scmp.lt.s32.totalorder %s2645_s22, %s2645_s22 }
  0x29   : > { %p2248_p13 = scmp.ne.s32.totalorder %s2645_s22, %s2247_s24  ;;  %p2256_p5 = scmp.lt.s32.totalorder %s2247_s24, %s2247_s24 }
  0x2b   : > { %p2250_p0 = pnand %p2248_p13, %p2666_p8  ;;  %p2257_p7 = por %p2256_p5, %p2255_p4 }
  0x2d   : > { %p2251_p2 = pneg %p2250_p0 }
  0x2f   : > { %p2258_p9 = pnand %p2257_p7, %p2251_p2 }
  0x31   : > { %2261 = shalt.err (!%p2258_p9)
}
  0x32   : > { %s2534_s26 = smov 64   ;;  %s2535_s27 = smov 4  }
  0x33   : > { %2061 = dma.hbm_to_vmem [thread:$0]  (!%p2652_p6), %s3119_s4, 3072, %s2645_s22, [#allocation9], %s2534_s26, %s2534_s26, %s2535_s27  }
  0x34   : > { %s3121_s6 = sld [smem:[#allocation31_spill]] }
  0x3a   : > { %s2262_s21 = scalar_lea.hbm %s3121_s6, 3072 }
  0x3b   : > { %p2263_p5 = scmp.ne.s32.totalorder %s3121_s6, %s2262_s21  ;;  %p2269_p12 = scmp.lt.u32.totalorder %s2262_s21, %s3121_s6 }
  0x3d   : > { %p2265_p10 = pnand %p2263_p5, %p2666_p8 }
  0x3f   : > { %p2266_p11 = pneg %p2265_p10 }
  0x41   : > { %p2271_p13 = pnand %p2269_p12, %p2266_p11 }
  0x43   : > { %2274 = shalt.err (!%p2271_p13)
}
  0x44   : > { %s2275_s22 = scalar_lea.vmem %s2656_s25, 3072  ;;  %p2283_p7 = scmp.lt.s32.totalorder %s2656_s25, %s2656_s25 }
  0x45   : > { %p2276_p0 = scmp.ne.s32.totalorder %s2656_s25, %s2275_s22  ;;  %p2284_p9 = scmp.lt.s32.totalorder %s2275_s22, %s2275_s22 }
  0x47   : > { %p2278_p2 = pnand %p2276_p0, %p2666_p8  ;;  %p2285_p5 = por %p2284_p9, %p2283_p7 }
  0x49   : > { %p2279_p4 = pneg %p2278_p2 }
  0x4b   : > { %p2286_p10 = pnand %p2285_p5, %p2279_p4 }
  0x4d   : > { %2289 = shalt.err (!%p2286_p10)
}
  0x4e   : > { %2067 = dma.hbm_to_vmem [thread:$0]  (!%p2652_p6), %s3121_s6, 3072, %s2656_s25, [#allocation12], %s2534_s26, %s2534_s26, %s2535_s27  }
  0x4f   : > { %s1733_s10 = sadd.s32 4294967294, %s2530_s18   ;;  %s43_s28 = sadd.s32 1, %s2526_s17 }
  0x50   : > { %p45_p11 = scmp.ge.s32.totalorder %s43_s28, 2  ;;  %s52_s29 = sadd.s32 1, %s2518_s15 }
  0x51   : > { %p59_p12 = scmp.ne.s32.totalorder %s2518_s15, %s2514_s14  ;;  %p60_p13 = scmp.eq.s32.totalorder %s2530_s18, 0 }
  0x52   : > { %s3166_s28 = smov (%p45_p11, %s43_s28), 0  ;;  %p65_p2 = scmp.ne.s32.totalorder %s2514_s14, %s2510_s13 }
  0x53   : > { %3122 = sst [smem:[#allocation24_spill]] %s3166_s28  ;;  %p2718_p0 = por %p60_p13, %p59_p12 }
  0x54   : > { %s47_s25 = ssub.s32 %s2526_s17, %s3166_s28  ;;  %p301_p4 = scmp.eq.s32.totalorder %s2636_s19, 1 }
  0x55   : > { %p50_p7 = scmp.eq.s32.totalorder %s47_s25, 0  ;;  %p2729_p9 = por %p3084_p1, %p65_p2 }
  0x56   : > { %p2733_p5 = por %p301_p4, %p59_p12  ;;  %p307_p10 = scmp.eq.s32.totalorder %s1733_s10, 1 }
  0x57   : > { %s3124_s26 = scalar_select %p2729_p9, 1, 0 }
  0x58   : > { %s3125_s27 = scalar_select %p2733_p5, 1, 0 }
  0x59   : > { %s2738_s12 = scalar_select %p50_p7, %s2518_s15, %s52_s29  }
  0x5a   : > { %3126 = sst [smem:[#allocation25_spill]] %s3125_s27  ;;  %p2740_p11 = por %p307_p10, %p65_p2 }
  0x5b   : > { %3127 = sst [smem:[#allocation26_spill]] %s2738_s12  ;;  %p2089_p13 = scmp.lt.s32.totalorder %s2530_s18, 2 }
  0x5c   : > { %s3128_s21 = scalar_select %p2740_p11, 1, 0 }
  0x5d   : > { %s2746_s24 = sand.u32 1, %s2518_s15   ;;  %s404_s22 = sand.u32 1, %s2530_s18  }
  0x5e   : > { %3129 = sst [smem:[#allocation27_spill]] %s3128_s21  ;;  %p2751_p1 = pnand %p2089_p13, %p2718_p0 }
  0x5f   : > { %s3087_s9 = sshll.u32 %s2746_s24, 1  ;;  %s3088_s10 = sshll.u32 %s2526_s17, 5 }
  0x60   : > { %s3130_s3 = scalar_select %p2751_p1, 1, 0 }
  0x61   : > { %s3131_s1 = sld [smem:[#allocation28_spill]]  ;;  %s408_s6 = scalar_lea.vmem [#allocation5], %s3087_s9 }
  0x62   : > { %s416_s30 = sshll.u32 %s408_s6, 4  ;;  %s2768_s28 = scalar_lea.sflag [#allocation6], %s404_s22  ;;  %s2766_s30 = int_to_ptr.vmem [resolvable:$true] %s416_s30 }
  0x63   : > { %p2774_p0 = pneg %p2751_p1 }
  0x65   : > { %s3132_s15 = scalar_select %p2774_p0, 1, 0 }
  0x67   : > { %s2762_s4 = scalar_lea.hbm %s3131_s1, %s3088_s10  ;;  %s2295_s9 = scalar_lea.hbm %s3131_s1, 64 }
  0x68   : > { %s2290_s12 = scalar_lea.hbm %s2762_s4, 32  ;;  %p2296_p7 = scmp.lt.u32.totalorder %s2762_s4, %s3131_s1 }
  0x69   : > { %p2291_p12 = scmp.ne.s32.totalorder %s2762_s4, %s2290_s12  ;;  %p2297_p10 = scmp.lt.u32.totalorder %s2295_s9, %s2290_s12 }
  0x6a   : > { %p2299_p11 = scmp.lt.u32.totalorder %s2290_s12, %s2762_s4 }
  0x6b   : > { %p2293_p2 = pnand %p2774_p0, %p2291_p12  ;;  %p2298_p13 = por %p2297_p10, %p2296_p7 }
  0x6d   : > { %p2294_p4 = pneg %p2293_p2  ;;  %p2300_p5 = por %p2299_p11, %p2298_p13 }
  0x6f   : > { %p2301_p9 = pnand %p2300_p5, %p2294_p4 }
  0x71   : > { %2304 = shalt.err (!%p2301_p9)
}
  0x72   : > { %s2305_s22 = scalar_lea.vmem %s2766_s30, 32  ;;  %s2536_s29 = smov [#allocation5]  }
  0x73   : > { %p2306_p12 = scmp.ne.s32.totalorder %s2766_s30, %s2305_s22  ;;  %s2310_s25 = sshll.u32 %s2536_s29, 4  ;;  %s2311_s25 = int_to_ptr.vmem [resolvable:$false] %s2310_s25 }
  0x74   : > { %s2312_s10 = scalar_lea.vmem %s2311_s25, 64  ;;  %p2313_p6 = scmp.lt.s32.totalorder %s2766_s30, %s2311_s25 }
  0x75   : > { %p2308_p2 = pnand %p2306_p12, %p2774_p0  ;;  %p2314_p8 = scmp.lt.s32.totalorder %s2312_s10, %s2305_s22 }
  0x77   : > { %p2309_p3 = pneg %p2308_p2  ;;  %p2315_p7 = por %p2314_p8, %p2313_p6 }
  0x79   : > { %p2316_p10 = pnand %p2315_p7, %p2309_p3 }
  0x7b   : > { %2319 = shalt.err (!%p2316_p10)
}
  0x7c   : > { %2077 = dma.hbm_to_vmem [thread:$0]  (!%p2751_p1), %s2762_s4, 32, %s2766_s30, %s2768_s28  }
  0x7d   : > { %s3133_s12 = sshll.u32 %s2526_s17, 5  ;;  %s2537_s1 = smov [#allocation10]  }
  0x7e   : > { %s2803_s29 = scalar_lea.hbm %s3074_s2, %s3133_s12  ;;  %s340_s25 = sshll.u32 %s2537_s1, 4  ;;  %s341_s25 = int_to_ptr.vmem [resolvable:$true] %s340_s25 }
  0x7f   : > { %s2538_s22 = smov [#allocation13]   ;;  %s2320_s13 = scalar_lea.hbm %s3077_s5, 16 }
  0x80   : > { %s364_s10 = sshll.u32 %s2538_s22, 4  ;;  %p2321_p3 = scmp.ne.s32.totalorder %s3077_s5, %s2320_s13  ;;  %s365_s10 = int_to_ptr.vmem [resolvable:$true] %s364_s10 }
  0x81   : > { %p3134_p6 = scmp.ne.s32.totalorder %s3120_s11, 0  ;;  %p2327_p5 = scmp.lt.u32.totalorder %s2320_s13, %s3077_s5 }
  0x83   : > { %p2323_p8 = pnand %p2321_p3, %p3134_p6 }
  0x85   : > { %p2324_p9 = pneg %p2323_p8 }
  0x87   : > { %p2329_p11 = pnand %p2327_p5, %p2324_p9 }
  0x89   : > { %2332 = shalt.err (!%p2329_p11)
}
  0x8a   : > { %s2333_s1 = scalar_lea.vmem %s341_s25, 16  ;;  %s2340_s18 = scalar_lea.vmem %s341_s25, 32 }
  0x8b   : > { %p2334_p4 = scmp.ne.s32.totalorder %s341_s25, %s2333_s1  ;;  %p2341_p2 = scmp.lt.s32.totalorder %s341_s25, %s341_s25 }
  0x8c   : > { %p2342_p7 = scmp.lt.s32.totalorder %s2340_s18, %s2333_s1 }
  0x8d   : > { %p2336_p13 = pnand %p2334_p4, %p3134_p6 }
  0x8e   : > { %p2343_p10 = por %p2342_p7, %p2341_p2 }
  0x8f   : > { %p2337_p12 = pneg %p2336_p13 }
  0x91   : > { %p2344_p1 = pnand %p2343_p10, %p2337_p12 }
  0x93   : > { %2347 = shalt.err (!%p2344_p1)
}
  0x94   : > { %p3135_p3 = scmp.ne.s32.totalorder %s3118_s23, 0  ;;  %s2348_s12 = scalar_lea.hbm %s3079_s7, 16 }
  0x95   : > { %p2349_p8 = scmp.ne.s32.totalorder %s3079_s7, %s2348_s12  ;;  %p2355_p1 = scmp.lt.u32.totalorder %s2348_s12, %s3079_s7 }
  0x96   : > { %2064 = dma.hbm_to_vmem [thread:$0]  (!%p3135_p3), %s3077_s5, 16, %s341_s25, [#allocation9]  }
  0x97   : > { %p2351_p9 = pnand %p2349_p8, %p3134_p6 }
  0x99   : > { %p2352_p5 = pneg %p2351_p9 }
  0x9b   : > { %p2357_p11 = pnand %p2355_p1, %p2352_p5 }
  0x9d   : > { %2360 = shalt.err (!%p2357_p11)
}
  0x9e   : > { %s2361_s30 = scalar_lea.vmem %s365_s10, 16  ;;  %s2368_s25 = scalar_lea.vmem %s365_s10, 32 }
  0x9f   : > { %p2362_p4 = scmp.ne.s32.totalorder %s365_s10, %s2361_s30  ;;  %p2369_p2 = scmp.lt.s32.totalorder %s365_s10, %s365_s10 }
  0xa0   : > { %p2370_p7 = scmp.lt.s32.totalorder %s2368_s25, %s2361_s30 }
  0xa1   : > { %p2364_p13 = pnand %p2362_p4, %p3134_p6 }
  0xa2   : > { %p2371_p10 = por %p2370_p7, %p2369_p2 }
  0xa3   : > { %p2365_p12 = pneg %p2364_p13 }
  0xa5   : > { %p2372_p0 = pnand %p2371_p10, %p2365_p12 }
  0xa7   : > { %2375 = shalt.err (!%p2372_p0)
}
  0xa8   : > { %2070 = dma.hbm_to_vmem [thread:$0]  (!%p3135_p3), %s3079_s7, 16, %s365_s10, [#allocation12]  }
  0xa9   : > { %s1740_s16 = sshll.u32 %s2746_s24, 4  ;;  %s1825_s11 = sshll.u32 %s2526_s17, 8 }
  0xaa   : > { %s2846_s21 = scalar_lea.hbm %s3072_s0, %s1825_s11  ;;  %s385_s23 = scalar_lea.vmem [#allocation2], %s1740_s16 }
  0xab   : > { %s394_s12 = sshll.u32 %s385_s23, 4  ;;  %s382_s9 = scalar_lea.sflag [#allocation3], %s2746_s24  ;;  %s2848_s12 = int_to_ptr.vmem [resolvable:$true] %s394_s12 }
  0xac   : > { %s2376_s6 = scalar_lea.hbm %s2846_s21, 256  ;;  %p3136_p6 = scmp.ne.s32.totalorder %s3132_s15, 0 }
  0xad   : > { %p2377_p0 = scmp.ne.s32.totalorder %s2846_s21, %s2376_s6  ;;  %s2381_s4 = scalar_lea.hbm %s3072_s0, 512 }
  0xae   : > { %p2382_p9 = scmp.lt.u32.totalorder %s2846_s21, %s3072_s0  ;;  %p2383_p5 = scmp.lt.u32.totalorder %s2381_s4, %s2376_s6 }
  0xaf   : > { %p2379_p3 = pnand %p2377_p0, %p3136_p6  ;;  %p2385_p11 = scmp.lt.u32.totalorder %s2376_s6, %s2846_s21 }
  0xb0   : > { %p2384_p1 = por %p2383_p5, %p2382_p9 }
  0xb1   : > { %p2380_p8 = pneg %p2379_p3 }
  0xb2   : > { %p2386_p4 = por %p2385_p11, %p2384_p1 }
  0xb4   : > { %p2387_p13 = pnand %p2386_p4, %p2380_p8 }
  0xb6   : > { %2390 = shalt.err (!%p2387_p13)
}
  0xb7   : > { %s2391_s1 = scalar_lea.vmem %s2848_s12, 256  ;;  %s2539_s18 = smov [#allocation2]  }
  0xb8   : > { %p2392_p12 = scmp.ne.s32.totalorder %s2848_s12, %s2391_s1  ;;  %s2396_s16 = sshll.u32 %s2539_s18, 4  ;;  %s2397_s16 = int_to_ptr.vmem [resolvable:$false] %s2396_s16 }
  0xb9   : > { %s2398_s11 = scalar_lea.vmem %s2397_s16, 512  ;;  %p2399_p10 = scmp.lt.s32.totalorder %s2848_s12, %s2397_s16 }
  0xba   : > { %p2394_p2 = pnand %p2392_p12, %p3136_p6  ;;  %p2400_p0 = scmp.lt.s32.totalorder %s2398_s11, %s2391_s1 }
  0xbc   : > { %p2395_p7 = pneg %p2394_p2  ;;  %p2401_p3 = por %p2400_p0, %p2399_p10 }
  0xbe   : > { %p2402_p9 = pnand %p2401_p3, %p2395_p7 }
  0xc0   : > { %2405 = shalt.err (!%p2402_p9)
}
  0xc1   : > { %s2540_s27 = smov 128   ;;  %s2541_s13 = smov 8  }
  0xc2   : > { %p3137_p8 = scmp.ne.s32.totalorder %s3130_s3, 0  ;;  %s3138_s23 = sshll.u32 %s2746_s24, 1 }
  0xc3   : > { %s427_s6 = scalar_lea.vmem [#allocation7], %s3138_s23  ;;  %s2406_s22 = scalar_lea.hbm %s2803_s29, 32 }
  0xc4   : > { %2074 = dma.hbm_to_vmem [thread:$0]  (!%p3137_p8), %s2846_s21, 256, %s2848_s12, %s382_s9, %s2540_s27, %s2540_s27, %s2541_s13  }
  0xc5   : > { %s435_s10 = sshll.u32 %s427_s6, 4  ;;  %p2407_p5 = scmp.ne.s32.totalorder %s2803_s29, %s2406_s22  ;;  %s436_s10 = int_to_ptr.vmem [resolvable:$true] %s435_s10 }
  0xc6   : > { %s2411_s25 = scalar_lea.hbm %s3074_s2, 64  ;;  %p2412_p4 = scmp.lt.u32.totalorder %s2803_s29, %s3074_s2 }
  0xc7   : > { %p2409_p1 = pnand %p2407_p5, %p3136_p6  ;;  %p2413_p13 = scmp.lt.u32.totalorder %s2411_s25, %s2406_s22 }
  0xc8   : > { %p2415_p2 = scmp.lt.u32.totalorder %s2406_s22, %s2803_s29 }
  0xc9   : > { %p2410_p11 = pneg %p2409_p1  ;;  %p2414_p12 = por %p2413_p13, %p2412_p4 }
  0xcb   : > { %p2416_p7 = por %p2415_p2, %p2414_p12 }
  0xcd   : > { %p2417_p10 = pnand %p2416_p7, %p2410_p11 }
  0xcf   : > { %2420 = shalt.err (!%p2417_p10)
}
  0xd0   : > { %s2421_s24 = scalar_lea.vmem %s436_s10, 32  ;;  %s2542_s21 = smov [#allocation7]  }
  0xd1   : > { %p2422_p0 = scmp.ne.s32.totalorder %s436_s10, %s2421_s24  ;;  %s2426_s12 = sshll.u32 %s2542_s21, 4  ;;  %s2427_s12 = int_to_ptr.vmem [resolvable:$false] %s2426_s12 }
  0xd2   : > { %s2428_s9 = scalar_lea.vmem %s2427_s12, 64  ;;  %p2429_p5 = scmp.lt.s32.totalorder %s436_s10, %s2427_s12 }
  0xd3   : > { %p2424_p3 = pnand %p2422_p0, %p3136_p6  ;;  %p2430_p1 = scmp.lt.s32.totalorder %s2428_s9, %s2421_s24 }
  0xd5   : > { %p2425_p9 = pneg %p2424_p3  ;;  %p2431_p8 = por %p2430_p1, %p2429_p5 }
  0xd7   : > { %p2432_p4 = pnand %p2431_p8, %p2425_p9 }
  0xd9   : > { %2435 = shalt.err (!%p2432_p4)
}
  0xda   : > { %p3139_p13 = scmp.ne.s32.totalorder %s3130_s3, 0  ;;  %p3140_p11 = scmp.ne.s32.totalorder %s3117_s20, 0 }
  0xdb   : > { %s2897_s15 = sand.u32 (!%p3140_p11), 1, %s2514_s14   ;;  %p3141_p6 = scmp.ne.s32.totalorder (!%p3140_p11), %s3124_s26, 0 }
  0xdc   : > { %2080 = dma.hbm_to_vmem [thread:$0]  (!%p3139_p13), %s2803_s29, 32, %s436_s10, %s2768_s28  }
  0xdd   : > { %457 = sbr.rel (%p3140_p11) target bundleno = 1091 (0x443), region = 60  ;;  %s1748_s16 = sshll.u32 (!%p3140_p11), %s2897_s15, 4 }
  0xde   : > { %s460_s11 = scalar_lea.sflag (!%p3140_p11), [#allocation3], %s2897_s15  ;;  %s2903_s27 = scalar_lea.vmem (!%p3140_p11), [#allocation2], %s1748_s16 }
  0xe4   : > { %2489 = dma.done.wait (%p3141_p6), %s460_s11, 256  }
  0xe5   : > { %2491 = vsyncadd (%p3141_p6), %s460_s11, 4294967040  ;;  %s468_s20 = sand.u32 1, %s2636_s19   ;;  %s1749_s28 = sshll.u32 %s2897_s15, 1 }
  0xe6   : > { %s469_s3 = scalar_lea.sflag [#allocation6], %s468_s20  ;;  %s2911_s29 = scalar_lea.vmem [#allocation5], %s1749_s28 }
  0xe7   : > { %2493 = dma.done.wait (%p3141_p6), %s469_s3, 64  }
  0xe8   : > { %2495 = vsyncadd (%p3141_p6), %s469_s3, 4294967232  ;;  %s2917_s13 = scalar_lea.vmem [#allocation7], %s1749_s28  ;;  %p3142_p8 = scmp.eq.s32.totalorder %s2636_s19, 0 }
  0xea   : > { %2497 = dma.done.wait (%p3142_p8), [#allocation9], 3088   ;;  %p3143_p12 = pmov %p3142_p8 }
  0xeb   : > { %p3144_p2 = pmov %p3142_p8 }
  0xec   : > { %2499 = vsyncadd (%p3143_p12), [#allocation9], 4294964208 }
  0xed   : > { %2501 = dma.done.wait (%p3144_p2), [#allocation12], 3088   ;;  %p3145_p7 = pmov %p3144_p2 }
  0xee   : > { %v2158_v0 = vld [vmem:[#allocation8 + $0x40] sm:$0xff]   ;;  %v2160_v2 = vld [vmem:[#allocation8 + $0x48] sm:$0xff]   ;;  %v2162_v4 = vld [vmem:[#allocation8 + $0x50] sm:$0xff]   ;;  %vm572_vm0 = vcmask 1041408   ;;  %vm619_vm1 = vsmask.f32 7424 }
  0xef   : > { %2503 = vsyncadd (%p3145_p7), [#allocation12], 4294964208  ;;  %v2159_v1 = vld [vmem:[#allocation8] sm:$0xff]   ;;  %1894 = vmatprep.subr.bf16.mxu0 %v2158_v0  ;;  %v2161_v3 = vld [vmem:[#allocation8 + $0x8] sm:$0xff]   ;;  %vm848_vm2 = vcmask 1046528   ;;  %v2543_v49 = vmov 0.0  }
  0xf0   : > { %1914 = vmatprep.subr.bf16.mxu1 %v2159_v1  ;;  %1895 = vmatpush3.bf16.msra.mxu0 %v2158_v0  ;;  %v2163_v5 = vld [vmem:[#allocation8 + $0x10] sm:$0xff]   ;;  %v2164_v6 = vld [vmem:[#allocation8 + $0x58] sm:$0xff]   ;;  %v2166_v8 = vld [vmem:[#allocation8 + $0x60] sm:$0xff]   ;;  %vm2544_vm3 = vmmov 0   ;;  %vm2545_vm9 = vmmov 1   ;;  %s3146_s4 = sld [smem:[#allocation22_spill]] }
  0xf1   : > { %1915 = vmatpush3.bf16.msra.mxu1 %v2159_v1  ;;  %1896 = vmatprep.subr.bf16.mxu0 %v2160_v2  ;;  %v2165_v7 = vld [vmem:[#allocation8 + $0x18] sm:$0xff]   ;;  %v2167_v9 = vld [vmem:[#allocation8 + $0x20] sm:$0xff]   ;;  %v2168_v10 = vld [vmem:[#allocation8 + $0x68] sm:$0xff]   ;;  %s3148_s6 = sld [smem:[#allocation32_spill]]  ;;  %s552_s10 = scalar_lea.vmem [#allocation14], %s1748_s16 }
  0xf2   : > { %1916 = vmatprep.subr.bf16.mxu1 %v2161_v3  ;;  %v2169_v11 = vld [vmem:[#allocation8 + $0x28] sm:$0xff]   ;;  %v2931_v13 = vld [vmem:[%s2903_s27 + $0x8] sm:$0xff]  ;;  %v568_v14 = vld [vmem:[%s2911_s29] sm:$0x3]  ;;  %s1544_s22 = sshll.u32 %s552_s10, 4  ;;  %s3149_s25 = sld [smem:[#allocation25_spill]]  ;;  %s3017_s22 = int_to_ptr.vmem [resolvable:$true] %s1544_s22 }
  0xf3   : > { %v2928_v12 = vld [vmem:[%s2903_s27] sm:$0xff]  ;;  %v574_v17 = vrot.slane %v2931_v13, 6  ;;  %v2170_v21 = vld [vmem:[#allocation8 + $0x70] sm:$0xff]   ;;  %v2174_v35 = vld [vmem:[#allocation8 + $0x80] sm:$0xff]   ;;  %s3150_s18 = sld [smem:[#allocation33_spill]]  ;;  %s2436_s12 = scalar_lea.vmem %s3017_s22, 256 }
  0xf4   : > { %1897 = vmatpush3.bf16.msra.mxu0 %v2160_v2  ;;  %v569_v15 = vld [vmem:[%s2917_s13] sm:$0x3]  ;;  %v573_v16 = vrot.slane %v2928_v12, 6  ;;  %v2171_v24 = vld [vmem:[#allocation8 + $0x30] sm:$0xff]   ;;  %v2175_v40 = vld [vmem:[#allocation8 + $0x88] sm:$0xff]   ;;  %s3147_s13 = sld [smem:[#allocation29_spill]]  ;;  %p2437_p0 = scmp.ne.s32.totalorder %s3017_s22, %s2436_s12 }
  0xf5   : > { %1917 = vmatpush3.bf16.msra.mxu1 %v2161_v3  ;;  %1898 = vmatprep.subr.bf16.mxu0 %v2162_v4  ;;  %v580_v18 = vrot.slane %v569_v15, 6  ;;  %v2172_v28 = vld [vmem:[#allocation8 + $0x78] sm:$0xff]   ;;  %v2176_v42 = vld [vmem:[#allocation8 + $0x90] sm:$0xff]   ;;  %v2178_v44 = vld [vmem:[#allocation8 + $0xa0] sm:$0xff]   ;;  %s2547_s9 = smov [#allocation14]  }
  0xf6   : > { %1918 = vmatprep.subr.bf16.mxu1 %v2163_v5  ;;  %v575_v19 = vsel %vm572_vm0, %v573_v16, %v574_v17  ;;  %v582_v20 = vsel %vm572_vm0, %v568_v14, %v573_v16  ;;  %v2173_v30 = vld [vmem:[#allocation8 + $0x38] sm:$0xff]   ;;  %v2179_v45 = vld [vmem:[#allocation8 + $0xa8] sm:$0xff]   ;;  %v2180_v46 = vld [vmem:[#allocation8 + $0xb0] sm:$0xff]   ;;  %p555_p10 = scmp.lt.s32.totalorder %s3146_s4, 1  ;;  %s1827_s30 = sshll.u32 %s3146_s4, 8 }
  0xf7   : > { %v583_v22 = vsel %vm572_vm0, %v574_v17, %v580_v18  ;;  %v584_v23 = vpack.c.bf16 %v575_v19, %v582_v20  ;;  %v2177_v43 = vld [vmem:[#allocation8 + $0x98] sm:$0xff]   ;;  %v2182_v48 = vld [vmem:[#allocation11] sm:$0xff]   ;;  %v2183_v50 = vld [vmem:[#allocation11 + $0x8] sm:$0xff]   ;;  %s2440_s11 = sshll.u32 %s2547_s9, 4  ;;  %s2441_s11 = int_to_ptr.vmem [resolvable:$false] %s2440_s11 }
  0xf8   : > { %1899 = vmatpush3.bf16.msra.mxu0 %v2162_v4  ;;  %v585_v25 = vpack.c.bf16 %v583_v22, %v583_v22  ;;  %v2181_v47 = vld [vmem:[#allocation8 + $0xb8] sm:$0xff]   ;;  %v2184_v51 = vld [vmem:[#allocation11 + $0x40] sm:$0xff]   ;;  %v2186_v53 = vld [vmem:[#allocation11 + $0x48] sm:$0xff]   ;;  %s556_s20 = scalar_select %p555_p10, %s3146_s4, 1 }
  0xf9   : > { %1919 = vmatpush3.bf16.msra.mxu1 %v2163_v5  ;;  %1900 = vmatprep.subr.bf16.mxu0 %v2164_v6  ;;  %v621_v26 = vshrl.u32 %v584_v23, 16  ;;  %v623_v27 = vshll.u32 %v584_v23, 16  ;;  %v849_v36 = vrot.slane %v584_v23, 1  ;;  %v2185_v52 = vld [vmem:[#allocation11 + $0x10] sm:$0xff]   ;;  %v2187_v54 = vld [vmem:[#allocation11 + $0x18] sm:$0xff]   ;;  %v2189_v56 = vld [vmem:[#allocation11 + $0x20] sm:$0xff]   ;;  %s3151_s24 = smov %s3150_s18  ;;  %s3023_s21 = scalar_lea.hbm %s3150_s18, %s1827_s30 }
  0xfa   : > { %1920 = vmatprep.subr.bf16.mxu1 %v2165_v7  ;;  %1930 = vmatprep.mubr.bf16.mxu1 %v584_v23  ;;  %v628_v29 = vshll.u32 %v585_v25, 16  ;;  %v632_v33 = vshrl.u32 %v585_v25, 16  ;;  %v850_v37 = vrot.slane %v585_v25, 1  ;;  %v2188_v55 = vld [vmem:[#allocation11 + $0x50] sm:$0xff]   ;;  %v2190_v57 = vld [vmem:[#allocation11 + $0x58] sm:$0xff]   ;;  %v2191_v58 = vld [vmem:[#allocation11 + $0x28] sm:$0xff]   ;;  %p2443_p1 = scmp.lt.s32.totalorder %s3017_s22, %s2441_s11 }
  0xfb   : > { %v625_v31 = vrot.slane %v623_v27, 1  ;;  %v2192_v59 = vld [vmem:[#allocation11 + $0x60] sm:$0xff]   ;;  %v2193_v60 = vld [vmem:[#allocation11 + $0x30] sm:$0xff]   ;;  %v2194_v61 = vld [vmem:[#allocation11 + $0x68] sm:$0xff]   ;;  %s1826_s28 = sshll.u32 %s556_s20, 4  ;;  %s1529_s4 = scalar_lea.sflag [#allocation4], %s2897_s15 }
  0xfc   : > { %1901 = vmatpush3.bf16.msra.mxu0 %v2164_v6  ;;  %v630_v32 = vrot.slane %v628_v29, 1  ;;  %v851_v41 = vsel %vm848_vm2, %v849_v36, %v850_v37  ;;  %v2195_v62 = vld [vmem:[#allocation11 + $0x38] sm:$0xff]   ;;  %v2196_v63 = vld [vmem:[#allocation11 + $0x70] sm:$0xff]   ;;  %s562_s19 = scalar_lea.vmem %s3147_s13, %s1826_s28  ;;  %p3152_p3 = scmp.ne.s32.totalorder %s3149_s25, 0 }
  0xfd   : > { %1921 = vmatpush3.bf16.msra.mxu1 %v2165_v7  ;;  %1902 = vmatprep.subr.bf16.mxu0 %v2166_v8  ;;  %v626_v34 = vor.u32 %v625_v31, %v621_v26  ;;  %v2197_v0 = vld [vmem:[#allocation11 + $0x78] sm:$0xff]   ;;  %s2442_s27 = scalar_lea.vmem %s2441_s11, 512 }
  0xfe   : > { %1922 = vmatprep.subr.bf16.mxu1 %v2167_v9  ;;  %v634_v39 = vor.u32 %v632_v33, %v630_v32  ;;  %v1782_v15 = vld [vmem:[#allocation10] ss:$0 sm:$0xff]  ;;  %p2438_p9 = pnand %p2437_p0, %p3152_p3  ;;  %p2444_p4 = scmp.lt.s32.totalorder %s2442_s27, %s2436_s12 }
  0xff   : > { %v631_v38 = vsel %vm619_vm1, %v626_v34, %v630_v32 }
 0x100   : > { %1903 = vmatpush3.bf16.msra.mxu0 %v2166_v8  ;;  %1910 = vmatprep.mubr.bf16.mxu0 %v631_v38  ;;  %p2439_p5 = pneg %p2438_p9  ;;  %p2445_p13 = por %p2444_p4, %p2443_p1 }
 0x101   : > { %1923 = vmatpush3.bf16.msra.mxu1 %v2167_v9  ;;  %1904 = vmatprep.subr.bf16.mxu0 %v2168_v10 }
 0x102   : > { %1924 = vmatprep.subr.bf16.mxu1 %v2169_v11  ;;  %p2446_p11 = pnand %p2445_p13, %p2439_p5 }
 0x104   : > { %1905 = vmatpush3.bf16.msra.mxu0 %v2168_v10 }
 0x105   : > { %1925 = vmatpush3.bf16.msra.mxu1 %v2169_v11  ;;  %1906 = vmatprep.subr.bf16.mxu0 %v2170_v21 }
 0x106   : > { %1926 = vmatprep.subr.bf16.mxu1 %v2171_v24 }
 0x108   : > { %1907 = vmatpush3.bf16.msra.mxu0 %v2170_v21 }
 0x109   : > { %1927 = vmatpush3.bf16.msra.mxu1 %v2171_v24  ;;  %1908 = vmatprep.subr.bf16.mxu0 %v2172_v28 }
 0x10a   : > { %1928 = vmatprep.subr.bf16.mxu1 %v2173_v30 }
 0x10c   : > { %1909 = vmatpush3.bf16.msra.mxu0 %v2172_v28 }
 0x10d   : > { %1929 = vmatpush3.bf16.msra.mxu1 %v2173_v30  ;;  %1934 = vmatprep.subr.bf16.mxu0 %v2174_v35 }
 0x10e   : > { %1954 = vmatprep.subr.bf16.mxu1 %v2543_v49 }
 0x10f   : > { %1911 = vmatmul.mubr.bf16.vlgmr.msra.gmra.mrb[0].mxu0 %v634_v39  ;;  %v998_v39 = vlaneseq }
 0x110   : > { %1931 = vmatmul.mubr.bf16.vlgmr.msra.gmra.mrb[0].mxu1 %v585_v25  ;;  %1935 = vmatpush3.bf16.msra.mxu0 %v2174_v35 }
 0x111   : > { %1936 = vmatprep.subr.bf16.mxu0 %v2175_v40  ;;  %1950 = vmatprep.mubr.bf16.mxu0 %v851_v41 }
 0x112   : > { %1955 = vmatpush3.bf16.msra.mxu1 %v2184_v51  ;;  %1970 = vmatprep.mubr.msk.bf16.mxu1 %vm2544_vm3, %v2543_v49 }
 0x113   : > { %1956 = vmatprep.subr.bf16.mxu1 %v2543_v49 }
 0x114   : > { %1937 = vmatpush3.bf16.msra.mxu0 %v2175_v40 }
 0x115   : > { %1938 = vmatprep.subr.bf16.mxu0 %v2176_v42 }
 0x116   : > { %1957 = vmatpush3.bf16.msra.mxu1 %v2186_v53 }
 0x117   : > { %1958 = vmatprep.subr.bf16.mxu1 %v2543_v49 }
 0x118   : > { %1939 = vmatpush3.bf16.msra.mxu0 %v2176_v42 }
 0x119   : > { %1940 = vmatprep.subr.bf16.mxu0 %v2177_v43 }
 0x11a   : > { %1959 = vmatpush3.bf16.msra.mxu1 %v2188_v55 }
 0x11b   : > { %1960 = vmatprep.subr.bf16.mxu1 %v2543_v49 }
 0x11c   : > { %1941 = vmatpush3.bf16.msra.mxu0 %v2177_v43 }
 0x11d   : > { %1942 = vmatprep.subr.bf16.mxu0 %v2178_v44 }
 0x11e   : > { %1961 = vmatpush3.bf16.msra.mxu1 %v2190_v57 }
 0x11f   : > { %1962 = vmatprep.subr.bf16.mxu1 %v2543_v49 }
 0x120   : > { %1943 = vmatpush3.bf16.msra.mxu0 %v2178_v44  ;;  %v999_v44 = vshrl.u32 %v998_v39, 7 }
 0x121   : > { %1944 = vmatprep.subr.bf16.mxu0 %v2179_v45 }
 0x122   : > { %1963 = vmatpush3.bf16.msra.mxu1 %v2192_v59 }
 0x123   : > { %1964 = vmatprep.subr.bf16.mxu1 %v2543_v49 }
 0x124   : > { %1945 = vmatpush3.bf16.msra.mxu0 %v2179_v45  ;;  %v1001_v45 = vadd.s32 16, %v999_v44 }
 0x125   : > { %1946 = vmatprep.subr.bf16.mxu0 %v2180_v46 }
 0x126   : > { %1965 = vmatpush3.bf16.msra.mxu1 %v2194_v61 }
 0x127   : > { %1966 = vmatprep.subr.bf16.mxu1 %v2543_v49 }
 0x128   : > { %1947 = vmatpush3.bf16.msra.mxu0 %v2180_v46  ;;  %v1005_v46 = vadd.s32 4294967295, %v1001_v45  ;;  %v1810_v45 = vld [vmem:[#allocation13] ss:$0 sm:$0xff] }
 0x129   : > { %1948 = vmatprep.subr.bf16.mxu0 %v2181_v47 }
 0x12a   : > { %1967 = vmatpush3.bf16.msra.mxu1 %v2196_v63  ;;  %vm1011_vm4 = vcmp.lt.s32.totalorder %v1005_v46, 16 }
 0x12b   : > { %1968 = vmatprep.subr.bf16.mxu1 %v2543_v49 }
 0x12c   : > { %1949 = vmatpush3.bf16.msra.mxu0 %v2181_v47 }
 0x12d   : > { %1974 = vmatprep.subr.bf16.mxu0 %v2543_v49 }
 0x12e   : > { %1969 = vmatpush3.bf16.msra.mxu1 %v2197_v0 }
 0x12f   : > { %1951 = vmatmul.mubr.bf16.vlgmr.msra.gmra.mrb[4].mxu0 %v850_v37  ;;  %1994 = vmatprep.subr.bf16.mxu1 %v2543_v49 }
 0x130   : > { %1975 = vmatpush3.bf16.msra.mxu0 %v2182_v48  ;;  %1990 = vmatprep.mubr.msk.bf16.mxu0 %vm2544_vm3, %v2543_v49  ;;  %v1003_v48 = vadd.s32 4294967295, %v999_v44 }
 0x131   : > { %1976 = vmatprep.subr.bf16.mxu0 %v2543_v49 }
 0x132   : > { %vm1006_vm6 = vcmp.ge.s32.totalorder %v1003_v48, 0 }
 0x133   : > { %vm1799_vm10 = vmpackc.low %vm2545_vm9, %vm1006_vm6 }
 0x134   : > { %1977 = vmatpush3.bf16.msra.mxu0 %v2183_v50 }
 0x135   : > { %1978 = vmatprep.subr.bf16.mxu0 %v2543_v49 }
 0x138   : > { %1979 = vmatpush3.bf16.msra.mxu0 %v2185_v52 }
 0x139   : > { %1980 = vmatprep.subr.bf16.mxu0 %v2543_v49 }
 0x13c   : > { %1981 = vmatpush3.bf16.msra.mxu0 %v2187_v54 }
 0x13d   : > { %1982 = vmatprep.subr.bf16.mxu0 %v2543_v49 }
 0x140   : > { %1983 = vmatpush3.bf16.msra.mxu0 %v2189_v56 }
 0x141   : > { %1984 = vmatprep.subr.bf16.mxu0 %v2543_v49 }
 0x144   : > { %1985 = vmatpush3.bf16.msra.mxu0 %v2191_v58 }
 0x145   : > { %1986 = vmatprep.subr.bf16.mxu0 %v2543_v49 }
 0x148   : > { %1987 = vmatpush3.bf16.msra.mxu0 %v2193_v60 }
 0x149   : > { %1988 = vmatprep.subr.bf16.mxu0 %v2543_v49 }
 0x14c   : > { %1989 = vmatpush3.bf16.msra.mxu0 %v2195_v62 }
 0x14d   : > { %2014 = vmatprep.subr.bf16.mxu0 %v2543_v49 }
 0x1e2   : > { %v1912_v1 = vpop.f32.mrb[0].mxu0 }
 0x1e3   : > { %v1932_v2 = vpop.f32.mrb[0].mxu1  ;;  %v719_v3 = vpop.f32.mrb[1].mxu0 }
 0x1e4   : > { %v824_v4 = vadd.f32 %v1932_v2, %v1912_v1  ;;  %v815_v5 = vpop.f32.mrb[1].mxu1  ;;  %v1913_v6 = vpop.f32.mrb[2].mxu0 }
 0x1e5   : > { %v816_v7 = vadd.f32 %v815_v5, %v719_v3  ;;  %v1933_v8 = vpop.f32.mrb[2].mxu1  ;;  %v722_v9 = vpop.f32.mrb[3].mxu0 }
 0x1e6   : > { %v818_v10 = vpop.f32.mrb[3].mxu1 }
 0x1e7   : > { %v819_v11 = vadd.f32 %v818_v10, %v722_v9 }
 0x202   : > { %v1952_v14 = vpop.f32.mrb[4].mxu0 }
 0x203   : > { %v952_v16 = vadd.f32 %v1952_v14, %v824_v4  ;;  %v936_v17 = vpop.f32.mrb[5].mxu0 }
 0x204   : > { %v950_v18 = vadd.f32 %v936_v17, %v816_v7  ;;  %v1953_v19 = vpop.f32.mrb[6].mxu0  ;;  %v2201_v17 = vld [vmem:[#allocation11 + $0x98] sm:$0xff]  }
 0x205   : > { %v962_v20 = vadd.f32 %v1782_v15, %v952_v16  ;;  %v939_v21 = vpop.f32.mrb[7].mxu0  ;;  %v2200_v16 = vld [vmem:[#allocation11 + $0x90] sm:$0xff]   ;;  %v2203_v19 = vld [vmem:[#allocation11 + $0xa8] sm:$0xff]  }
 0x206   : > { %v960_v22 = vadd.f32 %v1782_v15, %v950_v18  ;;  %v951_v23 = vadd.f32 %v939_v21, %v819_v11  ;;  %v2198_v11 = vld [vmem:[#allocation11 + $0x80] sm:$0xff]   ;;  %v2205_v21 = vld [vmem:[#allocation11 + $0xb8] sm:$0xff]  }
 0x207   : > { %v965_v24 = vmin.f32 %v962_v20, 20.0  ;;  %vm989_vm5 = vcmp.gt.f32.partialorder %v962_v20, 20.0  ;;  %v2202_v18 = vld [vmem:[#allocation11 + $0xa0] sm:$0xff]  }
 0x208   : > { %v963_v25 = vmin.f32 %v960_v22, 20.0  ;;  %v961_v26 = vadd.f32 %v1782_v15, %v951_v23  ;;  %vm987_vm7 = vcmp.gt.f32.partialorder %v960_v22, 20.0  ;;  %v2199_v15 = vld [vmem:[#allocation11 + $0x88] sm:$0xff]   ;;  %v2207_v23 = vld [vmem:[%s3080_s8 + $0x8] sm:$0xff]  }
 0x209   : > { %v970_v27 = vmul.f32 1.442695, %v965_v24  ;;  %v2208_v24 = vld [vmem:[%s3080_s8 + $0x10] sm:$0xff]  }
 0x20a   : > { %v966_v28 = vmul.f32 1.442695, %v963_v25  ;;  %v964_v29 = vmin.f32 %v961_v26, 20.0  ;;  %vm988_vm8 = vcmp.gt.f32.partialorder %v961_v26, 20.0  ;;  %v2209_v25 = vld [vmem:[%s3080_s8 + $0x18] sm:$0xff]  }
 0x20b   : > { %2214 = vpow2.f32 %v970_v27  ;;  %v2211_v27 = vld [vmem:[%s3080_s8 + $0x28] sm:$0xff]  }
 0x20c   : > { %2216 = vpow2.f32 %v966_v28  ;;  %v968_v30 = vmul.f32 1.442695, %v964_v29  ;;  %v2212_v28 = vld [vmem:[%s3080_s8 + $0x30] sm:$0xff]   ;;  %v2213_v29 = vld [vmem:[%s3080_s8 + $0x38] sm:$0xff]  }
 0x20e   : > { %2218 = vpow2.f32 %v968_v30  ;;  %v2546_v30 = vmov 0  }
 0x20f   : > { %2157 = vset.pattern.permute.xlu0 %v2546_v30 }
 0x215   : > { %v2215_v31 = vpop.eup %2214 }
 0x216   : > { %v2217_v32 = vpop.eup %2216  ;;  %v974_v33 = vadd.f32 2.0, %v2215_v31 }
 0x217   : > { %v972_v34 = vadd.f32 2.0, %v2217_v32 }
 0x218   : > { %v2219_v35 = vpop.eup %2218  ;;  %v977_v36 = vmul.f32 %v2215_v31, %v974_v33  ;;  %v1510_v31 = vld [vmem:[%s562_s19] sm:$0xff] }
 0x219   : > { %v975_v37 = vmul.f32 %v2217_v32, %v972_v34  ;;  %v973_v38 = vadd.f32 2.0, %v2219_v35  ;;  %v1511_v32 = vld [vmem:[%s562_s19 + $0x8] sm:$0xff]  ;;  %vm1512_vm11 = vcmp.gt.f32.partialorder %v1510_v31, 0.5 }
 0x21a   : > { %v980_v40 = vadd.f32 2.0, %v977_v36  ;;  %vm1513_vm12 = vcmp.gt.f32.partialorder %v1511_v32, 0.5  ;;  %v1514_v33 = vsel %vm1512_vm11, 1, %v2546_v30 }
 0x21b   : > { %v978_v41 = vadd.f32 2.0, %v975_v37  ;;  %v976_v42 = vmul.f32 %v2219_v35, %v973_v38  ;;  %1517 = vperm.xlu0 %2157, %v1514_v33  }
 0x21c   : > { %2220 = vrcp.f32 %v980_v40 }
 0x21d   : > { %2222 = vrcp.f32 %v978_v41  ;;  %v979_v43 = vadd.f32 2.0, %v976_v42 }
 0x21f   : > { %2224 = vrcp.f32 %v979_v43 }
 0x226   : > { %v2221_v47 = vpop.eup %2220 }
 0x227   : > { %v2223_v50 = vpop.eup %2222  ;;  %v986_v51 = vmul.f32 %v2221_v47, %v977_v36 }
 0x228   : > { %v984_v52 = vmul.f32 %v2223_v50, %v975_v37 }
 0x229   : > { %v2225_v53 = vpop.eup %2224  ;;  %v992_v54 = vmul.f32 %v986_v51, %v962_v20 }
 0x22a   : > { %v990_v55 = vmul.f32 %v984_v52, %v960_v22  ;;  %v985_v56 = vmul.f32 %v2225_v53, %v976_v42 }
 0x22b   : > { %v995_v57 = vsel %vm989_vm5, %v962_v20, %v992_v54  ;;  %v2204_v20 = vld [vmem:[#allocation11 + $0xb0] sm:$0xff]  }
 0x22c   : > { %v991_v58 = vmul.f32 %v985_v56, %v961_v26  ;;  %v993_v59 = vsel %vm987_vm7, %v960_v22, %v990_v55  ;;  %v1023_v60 = vsel %vm1011_vm4, %v995_v57, 0.0  ;;  %v2206_v22 = vld [vmem:[%s3080_s8] sm:$0xff]  }
 0x22d   : > { %v1021_v61 = vsel %vm1006_vm6, %v993_v59, 0.0  ;;  %v1025_v62 = vpack.c.bf16 %v1023_v60, %v1023_v60 }
 0x22e   : > { %v994_v63 = vsel %vm988_vm8, %v961_v26, %v991_v58  ;;  %v2210_v26 = vld [vmem:[%s3080_s8 + $0x20] sm:$0xff]  }
 0x22f   : > { %v1024_v0 = vpack.c.bf16 %v994_v63, %v1021_v61  ;;  %v1800_v1 = vpack.c.bf16 %v994_v63, %v993_v59  ;;  %v1067_v3 = vshll.u32 %v1025_v62, 16  ;;  %v1270_v5 = vrot.slane %v1025_v62, 1 }
 0x231   : > { %1991 = vmatmul.mubr.msk.bf16.vlgmr.msra.gmra.mrb[8].mxu0 %vm1799_vm10, %v1800_v1  ;;  %v1062_v2 = vshll.u32 %v1024_v0, 16  ;;  %v1269_v4 = vrot.slane %v1024_v0, 1  ;;  %v1060_v6 = vshrl.u32 %v1024_v0, 16  ;;  %v1069_v10 = vrot.slane %v1067_v3, 1 }
 0x232   : > { %2030 = vmatprep.mubr.msk.bf16.mxu0 %vm2544_vm3, %v2543_v49  ;;  %2015 = vmatpush3.bf16.msra.mxu0 %v2206_v22 }
 0x233   : > { %v1064_v7 = vrot.slane %v1062_v2, 1  ;;  %v1271_v8 = vsel %vm848_vm2, %v1269_v4, %v1270_v5  ;;  %2016 = vmatprep.subr.bf16.mxu0 %v2543_v49 }
 0x235   : > { %v1065_v9 = vor.u32 %v1064_v7, %v1060_v6 }
 0x236   : > { %2017 = vmatpush3.bf16.msra.mxu0 %v2207_v23 }
 0x237   : > { %v1070_v14 = vsel %vm619_vm1, %v1065_v9, %v1069_v10  ;;  %2018 = vmatprep.subr.bf16.mxu0 %v2543_v49 }
 0x238   : > { %1971 = vmatmul.mubr.bf16.vlgmr.msra.gmra.mrb[4].mxu1 %v1070_v14  ;;  %v1811_v14 = vld [vmem:[%s3148_s6] ss:$0 sm:$0xff] }
 0x239   : > { %1995 = vmatpush3.bf16.msra.mxu1 %v2198_v11  ;;  %2010 = vmatprep.mubr.msk.bf16.mxu1 %vm2544_vm3, %v2543_v49 }
 0x23a   : > { %1996 = vmatprep.subr.bf16.mxu1 %v2543_v49  ;;  %2019 = vmatpush3.bf16.msra.mxu0 %v2208_v24 }
 0x23b   : > { %2020 = vmatprep.subr.bf16.mxu0 %v2543_v49 }
 0x23d   : > { %1997 = vmatpush3.bf16.msra.mxu1 %v2199_v15 }
 0x23e   : > { %1998 = vmatprep.subr.bf16.mxu1 %v2543_v49  ;;  %2021 = vmatpush3.bf16.msra.mxu0 %v2209_v25 }
 0x23f   : > { %2022 = vmatprep.subr.bf16.mxu0 %v2543_v49 }
 0x241   : > { %1999 = vmatpush3.bf16.msra.mxu1 %v2200_v16 }
 0x242   : > { %2000 = vmatprep.subr.bf16.mxu1 %v2543_v49  ;;  %2023 = vmatpush3.bf16.msra.mxu0 %v2210_v26 }
 0x243   : > { %2024 = vmatprep.subr.bf16.mxu0 %v2543_v49 }
 0x245   : > { %2001 = vmatpush3.bf16.msra.mxu1 %v2201_v17 }
 0x246   : > { %2002 = vmatprep.subr.bf16.mxu1 %v2543_v49  ;;  %2025 = vmatpush3.bf16.msra.mxu0 %v2211_v27 }
 0x247   : > { %2026 = vmatprep.subr.bf16.mxu0 %v2543_v49 }
 0x249   : > { %2003 = vmatpush3.bf16.msra.mxu1 %v2202_v18 }
 0x24a   : > { %2004 = vmatprep.subr.bf16.mxu1 %v2543_v49  ;;  %2027 = vmatpush3.bf16.msra.mxu0 %v2212_v28 }
 0x24b   : > { %2028 = vmatprep.subr.bf16.mxu0 %v2543_v49 }
 0x24d   : > { %2005 = vmatpush3.bf16.msra.mxu1 %v2203_v19 }
 0x24e   : > { %2006 = vmatprep.subr.bf16.mxu1 %v2543_v49  ;;  %2029 = vmatpush3.bf16.msra.mxu0 %v2213_v29 }
 0x251   : > { %2007 = vmatpush3.bf16.msra.mxu1 %v2204_v20 }
 0x252   : > { %2008 = vmatprep.subr.bf16.mxu1 %v2543_v49  ;;  %v1515_v49 = vsel %vm1513_vm12, 1, %v2546_v30 }
 0x253   : > { %1520 = vperm.xlu0 %2157, %v1515_v49  }
 0x255   : > { %2009 = vmatpush3.bf16.msra.mxu1 %v2205_v21 }
 0x258   : > { %2011 = vmatmul.mubr.bf16.vlgmr.msra.gmra.mrb[8].mxu1 %v1271_v8 }
 0x29a   : > { %v1518_v11 = vpop.permute.xlu0 %1517 }
 0x29b   : > { %vm1522_vm15 = vcmp.eq.s32.totalorder %v1518_v11, 1 }
 0x2d2   : > { %v1521_v20 = vpop.permute.xlu0 %1520 }
 0x2d3   : > { %vm1523_vm0 = vcmp.eq.s32.totalorder %v1521_v20, 1 }
 0x304   : > { %v1243_v34 = vpop.f32.mrb[8].mxu0 }
 0x305   : > { %v1992_v35 = vpop.f32.mrb[9].mxu0 }
 0x306   : > { %v1246_v36 = vpop.f32.mrb[10].mxu0 }
 0x307   : > { %v1993_v37 = vpop.f32.mrb[11].mxu0 }
 0x30b   : > { %v1154_v38 = vpop.f32.mrb[4].mxu1 }
 0x30c   : > { %v1244_v39 = vadd.f32 %v1243_v34, %v1154_v38  ;;  %v1972_v40 = vpop.f32.mrb[5].mxu1 }
 0x30d   : > { %v1157_v41 = vpop.f32.mrb[6].mxu1 }
 0x30e   : > { %v1247_v42 = vadd.f32 %v1246_v36, %v1157_v41  ;;  %v1973_v43 = vpop.f32.mrb[7].mxu1 }
 0x32b   : > { %v1355_v44 = vpop.f32.mrb[8].mxu1 }
 0x32c   : > { %v1362_v46 = vadd.f32 %v1355_v44, %v1244_v39  ;;  %v2012_v47 = vpop.f32.mrb[9].mxu1 }
 0x32d   : > { %v1358_v48 = vpop.f32.mrb[10].mxu1 }
 0x32e   : > { %v1371_v50 = vadd.f32 %v1810_v45, %v1362_v46  ;;  %v1363_v51 = vadd.f32 %v1358_v48, %v1247_v42  ;;  %v2013_v52 = vpop.f32.mrb[11].mxu1 }
 0x330   : > { %v1373_v53 = vmin.f32 %v1371_v50, 20.0  ;;  %v1372_v54 = vadd.f32 %v1810_v45, %v1363_v51  ;;  %vm1389_vm13 = vcmp.gt.f32.partialorder %v1371_v50, 20.0 }
 0x332   : > { %v1375_v55 = vmul.f32 1.442695, %v1373_v53  ;;  %v1374_v56 = vmin.f32 %v1372_v54, 20.0  ;;  %vm1390_vm14 = vcmp.gt.f32.partialorder %v1372_v54, 20.0 }
 0x334   : > { %2226 = vpow2.f32 %v1375_v55  ;;  %v1377_v57 = vmul.f32 1.442695, %v1374_v56 }
 0x336   : > { %2228 = vpow2.f32 %v1377_v57 }
 0x33e   : > { %v2227_v58 = vpop.eup %2226 }
 0x33f   : > { %v1379_v59 = vadd.f32 2.0, %v2227_v58 }
 0x340   : > { %v2229_v60 = vpop.eup %2228 }
 0x341   : > { %v1381_v61 = vmul.f32 %v2227_v58, %v1379_v59  ;;  %v1380_v62 = vadd.f32 2.0, %v2229_v60 }
 0x343   : > { %v1383_v63 = vadd.f32 2.0, %v1381_v61  ;;  %v1382_v0 = vmul.f32 %v2229_v60, %v1380_v62 }
 0x345   : > { %2230 = vrcp.f32 %v1383_v63  ;;  %v1384_v1 = vadd.f32 2.0, %v1382_v0 }
 0x347   : > { %2232 = vrcp.f32 %v1384_v1 }
 0x34f   : > { %v2231_v2 = vpop.eup %2230 }
 0x350   : > { %v1387_v3 = vmul.f32 %v2231_v2, %v1381_v61 }
 0x351   : > { %v2233_v4 = vpop.eup %2232 }
 0x352   : > { %v1391_v5 = vmul.f32 %v1387_v3, %v1371_v50  ;;  %v1388_v6 = vmul.f32 %v2233_v4, %v1382_v0 }
 0x354   : > { %v1392_v7 = vmul.f32 %v1388_v6, %v1372_v54  ;;  %v1393_v8 = vsel %vm1389_vm13, %v1371_v50, %v1391_v5 }
 0x356   : > { %v1394_v9 = vsel %vm1390_vm14, %v1372_v54, %v1392_v7 }
 0x357   : > { %v1395_v10 = vpack.c.bf16 %v1394_v9, %v1393_v8 }
 0x359   : > { %2031 = vmatmul.mubr.bf16.vlgmr.msra.gmra.mrb[12].mxu0 %v1395_v10 }
 0x42c   : > { %v1501_v15 = vpop.f32.mrb[12].mxu0 }
 0x42d   : > { %v1502_v16 = vadd.f32 %v1811_v14, %v1501_v15  ;;  %v2032_v17 = vpop.f32.mrb[13].mxu0 }
 0x42e   : > { %v1504_v18 = vpop.f32.mrb[14].mxu0 }
 0x42f   : > { %v1508_v19 = vadd.f32 %v1502_v16, %v2928_v12  ;;  %v1505_v21 = vadd.f32 %v1811_v14, %v1504_v18  ;;  %v2033_v22 = vpop.f32.mrb[15].mxu0 }
 0x431   : > { %v1524_v23 = vsel %vm1522_vm15, %v1508_v19, 0.0  ;;  %v1509_v24 = vadd.f32 %v1505_v21, %v2931_v13 }
 0x432   : > { %1526 = vst [vmem:[%s552_s10] sm:$0xff] %v1524_v23 }
 0x433   : > { %v1525_v12 = vsel %vm1523_vm0, %v1509_v24, 0.0 }
 0x434   : > { %1527 = vst [vmem:[%s552_s10 + $0x8] sm:$0xff] %v1525_v12 }
 0x435   : > { %2449 = shalt.err (!%p2446_p11)
}
 0x436   : > { %s2450_s20 = scalar_lea.hbm %s3023_s21, 256  ;;  %s2454_s29 = scalar_lea.hbm %s3151_s24, 512 }
 0x437   : > { %p2451_p6 = scmp.ne.s32.totalorder %s3023_s21, %s2450_s20  ;;  %p2455_p2 = scmp.lt.u32.totalorder %s3023_s21, %s3151_s24 }
 0x438   : > { %p2456_p7 = scmp.lt.u32.totalorder %s2454_s29, %s2450_s20  ;;  %p2458_p0 = scmp.lt.u32.totalorder %s2450_s20, %s3023_s21 }
 0x439   : > { %p2452_p8 = pnand %p2451_p6, %p3152_p3 }
 0x43a   : > { %p2457_p10 = por %p2456_p7, %p2455_p2 }
 0x43b   : > { %p2453_p12 = pneg %p2452_p8 }
 0x43c   : > { %p2459_p9 = por %p2458_p0, %p2457_p10 }
 0x43e   : > { %p2460_p5 = pnand %p2459_p9, %p2453_p12 }
 0x440   : > { %2463 = shalt.err (!%p2460_p5)
}
 0x441   : > { %s2548_s26 = smov 128   ;;  %s2549_s23 = smov 8  }
 0x442   : > { %2056 = dma.vmem_to_hbm [thread:$0]  (%p3152_p3), %s3017_s22, 256, %s3023_s21, %s1529_s4, %s2548_s26, %s2548_s26, %s2549_s23  }
 0x443 PF: > { %s3153_s6 = sld [smem:[#allocation20_spill]]  ;;  %s3154_s10 = sld [smem:[#allocation27_spill]] }
 0x444   : > { %s3155_s30 = sld [smem:[#allocation23_spill]] }
 0x449   : > { %s1559_s16 = sand.u32 1, %s3153_s6   ;;  %p3156_p1 = scmp.ne.s32.totalorder %s3154_s10, 0 }
 0x44a   : > { %p3157_p4 = scmp.ge.s32.totalorder %s3155_s30, 2  ;;  %s1560_s1 = scalar_lea.sflag [#allocation4], %s1559_s16 }
 0x44c   : > { %p2082_p13 = pnand %p3157_p4, %p3156_p1 }
 0x44e   : > { %2505 = dma.done.wait (!%p2082_p13), %s1560_s1, 256  }
 0x44f   : > { %2507 = vsyncadd (!%p2082_p13), %s1560_s1, 4294967040  ;;  %s31_s18 = sadd.s32 1, %s3155_s30   ;;  %s3158_s12 = sld [smem:[#allocation21_spill]] }
 0x450   : > { %p28_p11 = scmp.ge.s32.totalorder %s31_s18, 4   ;;  %s3159_s15 = sld [smem:[#allocation26_spill]] }
 0x451   : > { %s3160_s25 = sld [smem:[#allocation24_spill]]  ;;  %s3161_s13 = smov %s2514_s14 }
 0x452   : > { %s3163_s16 = smov %s2526_s17  ;;  %30 = sbr.rel (!%p28_p11) target bundleno = 17 (0x11), region = 152 }
 0x455   : > { %s3162_s14 = smov %s3158_s12 }
 0x457   : > { %s3164_s17 = smov %s3160_s25 }
 0x459   :  { %1565 = vsyncpa [#allocation3], 1 }
 0x45a   :  { %1567 = vsyncpa [#allocation3 + $0x1], 1 }
 0x45b   :  { %1568 = vsyncpa [#allocation6], 1 }
 0x45c   :  { %1570 = vsyncpa [#allocation6 + $0x1], 1 }
 0x45d   :  { %1571 = vsyncpa [#allocation9], 1 }
 0x45e   :  { %1572 = vsyncpa [#allocation12], 1 }
 0x45f   :  { %1573 = vsyncpa [#allocation4], 1 }
 0x460   :  { %1575 = vsyncpa [#allocation4 + $0x1], 1 }

</bundles_post_ra>
